<compile_context>
chip_gen: v5e
topology: v5e:2x2
jax: 0.10.0
libtpu: 0.0.40
codegen_flags: <defaults>
</compile_context>

<pallas_src>
import math

import jax
import jax.numpy as jnp
from jax.experimental import pallas as pl
from jax.experimental.pallas import tpu as pltpu

_EPS = 1e-5  # torch.nn.LayerNorm default eps


def _layernorm(x, gamma, beta):
    mu = jnp.mean(x, axis=-1, keepdims=True)
    var = jnp.mean(jnp.square(x - mu), axis=-1, keepdims=True)
    return (x - mu) * jax.lax.rsqrt(var + _EPS) * gamma + beta


# ------------------------------------------------------------------ kernel

def egt_main_kernel(q_ref, kv_ref, feat_ref, edge_ref,
                    hm_ref, hmt_ref,
                    ge0_ref, be0_ref, web_ref, beb_ref,
                    wvvv_ref, wvve_ref, bvv_ref, w_ref, gm_ref, bm_ref,
                    wm0_ref, bm0_ref, wm1_ref, bm1_ref,
                    ge1_ref, be1_ref, wf0_ref, bf0_ref, wf1_ref, bf1_ref,
                    h_out_ref, e_out_ref,
                    m_ref, l_ref, accv_ref, acce_ref):
    """One (dst-tile, src-chunk) grid step.

    Per step: edge LN + fused edge_e/edge_b projection, attention scores,
    ONLINE edge-softmax accumulation over source chunks, the per-chunk edge
    residual MLP (written immediately), and -- on the last source chunk --
    aggregation normalization, node update and the node residual MLP.
    """
    f32, bf16 = jnp.float32, jnp.bfloat16
    Td, D = q_ref.shape                 # destination-node tile
    Sc = kv_ref.shape[0]                # source-node chunk
    H = ge0_ref.shape[1]
    R = Sc * Td                         # edges handled by this grid step

    s = pl.program_id(1)
    n_src = pl.num_programs(1)

    # ---- init online-softmax accumulators at the first source chunk --------
    @pl.when(s == 0)
    def _():
        m_ref[...] = jnp.full(m_ref.shape, -jnp.inf, dtype=m_ref.dtype)
        l_ref[...] = jnp.zeros(l_ref.shape, dtype=l_ref.dtype)
        accv_ref[...] = jnp.zeros(accv_ref.shape, dtype=accv_ref.dtype)
        acce_ref[...] = jnp.zeros(acce_ref.shape, dtype=acce_ref.dtype)

    # ---- edge block: LayerNorm + fused edge_e | edge_b projection ----------
    eg = edge_ref[...].astype(f32)                                  # (Sc, Td, H)
    ew = _layernorm(eg.reshape(R, H), ge0_ref[...], be0_ref[...])
    eb = jnp.dot(ew.astype(bf16), web_ref[...],
                 preferred_element_type=f32) + beb_ref[...]         # (R, 2H)
    ev3 = eb[:, :H].reshape(Sc, Td, H)                              # edge_e value
    b3 = eb[:, H:].reshape(Sc, Td, H)                               # edge_b bias

    # ---- attention scores: per-head k.q via head-mask matmul (MXU, bf16) ----
    q = q_ref[...]                                                  # (Td, D)
    kv = kv_ref[...]                                                # (Sc, 2D)
    k = kv[:, :D]
    v = kv[:, D:]
    kq = (k[:, None, :] * q[None, :, :]).astype(bf16)               # (Sc, Td, D)
    score = jnp.dot(kq.reshape(R, D), hm_ref[...],
                    preferred_element_type=f32).reshape(Sc, Td, H)
    score = score * 0.5 + b3             # torch: score / self.scale (=2) + B
    e3 = score + eg                      # residual edge stream (raw edge feats)

    # ---- online edge softmax over incoming edges (source axis) -------------
    hmt = hmt_ref[...]                                              # (H, D) f32
    m_prev = m_ref[...]                                             # (Td, H)
    m_new = jnp.maximum(m_prev, jnp.max(score, axis=0))             # (Td, H)
    alpha = jnp.exp(m_prev - m_new)                                 # (Td, H)
    p = jnp.exp(score - m_new[None, :, :])                          # (Sc, Td, H)
    l_ref[...] = alpha * l_ref[...] + jnp.sum(p, axis=0)

    # head expansion of the unnormalized attention (MXU, bf16 operands)
    p_exp = jnp.dot(p.reshape(R, H).astype(bf16), hmt.astype(bf16),
                    preferred_element_type=f32).reshape(Sc, Td, D)
    alpha_exp = jnp.dot(alpha, hmt, preferred_element_type=f32)     # tiny, f32
    accv_ref[...] = alpha_exp * accv_ref[...] + jnp.sum(p_exp * v[:, None, :],
                                                        axis=0)     # (Td, D)
    acce_ref[...] = alpha * acce_ref[...] + jnp.sum(p * ev3, axis=0)  # (Td, H)
    m_ref[...] = m_new

    # ---- last source chunk: normalize, node update, node residual MLP ------
    @pl.when(s == n_src - 1)
    def _():
        inv_l = pl.reciprocal(l_ref[...], approx=True)              # (Td, H)
        inv_l_exp = jnp.dot(inv_l, hmt, preferred_element_type=f32)  # (Td, D)
        p1 = accv_ref[...] * inv_l_exp                              # agg of v_src
        p2 = acce_ref[...] * inv_l                                  # agg of edge_v
        vv = (jnp.dot(p1.astype(bf16), wvvv_ref[...], preferred_element_type=f32)
              + jnp.dot(p2.astype(bf16), wvve_ref[...], preferred_element_type=f32)
              + bvv_ref[...])
        h = feat_ref[...] * (1.0 + w_ref[0, 0]) + vv
        hn = _layernorm(h, gm_ref[...], bm_ref[...])
        t = jnp.maximum(jnp.dot(hn.astype(bf16), wm0_ref[...],
                                preferred_element_type=f32) + bm0_ref[...], 0.0)
        h_out_ref[...] = (h + jnp.dot(t.astype(bf16), wm1_ref[...],
                                      preferred_element_type=f32)
                          + bm1_ref[...]).astype(h_out_ref.dtype)

    # ---- edge residual MLP (per chunk, written every step) ------------------
    ef = e3.reshape(R, H)
    en = _layernorm(ef, ge1_ref[...], be1_ref[...])
    te = jnp.maximum(jnp.dot(en.astype(bf16), wf0_ref[...],
                             preferred_element_type=f32) + bf0_ref[...], 0.0)
    eo = ef + jnp.dot(te.astype(bf16), wf1_ref[...],
                      preferred_element_type=f32) + bf1_ref[...]
    e_out_ref[...] = eo.reshape(Sc, Td, H).astype(e_out_ref.dtype)


# ------------------------------------------------------------------ wrapper

def _pick_tile(n, cap=128, prefer_multi=False):
    """Largest multiple-of-8 tile <= cap that divides n; optionally prefer a
    tile giving >= 2 grid steps (v7x megacore)."""
    cands = [t for t in range(8, min(n, cap) + 1, 8) if n % t == 0]
    if not cands:
        return n
    if prefer_multi:
        multi = [t for t in cands if n // t >= 2]
        if multi:
            return max(multi)
    return max(cands)


def _vmem_limit_bytes():
    cap = 64 * 2 ** 20
    try:
        cap = int(pltpu.get_tpu_info().vmem_capacity_bytes)
    except Exception:
        pass
    # ~3/4 of physical VMEM, clamped: 48 MiB on v7x (64 MiB), 96 MiB on v5e/v6e.
    return int(min(max((3 * cap) // 4, 48 * 2 ** 20), 96 * 2 ** 20))


def egt_forward(feat, edge, p, *, dst_tile=None, src_chunk=None):
    N, D = feat.shape
    H = D // 3
    hd = D // H                          # = 3
    E = edge.shape[0]
    assert E == N * N, "dense complete graph assumed (E = N*N)"
    assert N % 8 == 0, "this implementation tiles nodes in multiples of 8"
    f32, bf16 = jnp.float32, jnp.bfloat16

    # ---- fused / repacked parameters (tiny XLA-side ops) --------------------
    wqkv = jnp.concatenate([p["wq"], p["wk"], p["wv"]], axis=1).astype(bf16)  # (D, 3D)
    bqkv = jnp.concatenate([p["bq"], p["bk"], p["bv"]], axis=1)               # (1, 3D)
    web = jnp.concatenate([p["we"], p["wb"]], axis=1).astype(bf16)            # (H, 2H)
    beb = jnp.concatenate([p["bee"], p["bbb"]], axis=1)                       # (1, 2H)
    # vv weight rows are interleaved per head as [v0, v1, v2, edge_v]; split so
    # the kernel sums two dots instead of concatenating the aggregate.
    wvv_rows = p["wvv"].reshape(H, hd + 1, D)
    wvv_v = wvv_rows[:, :hd, :].reshape(H * hd, D).astype(bf16)               # (D, D)
    wvv_e = wvv_rows[:, hd, :].astype(bf16)                                   # (H, D)
    wm0 = p["wm0"].astype(bf16)
    wm1 = p["wm1"].astype(bf16)
    wf0 = p["wf0"].astype(bf16)
    wf1 = p["wf1"].astype(bf16)
    # head-membership mask: feature column c of q/k/v belongs to head c // hd
    hm = (jnp.arange(D)[:, None] // hd == jnp.arange(H)[None, :])
    hm_bf = hm.astype(bf16)                                                   # (D, H)
    hmt = hm.T.astype(f32)                                                    # (H, D)

    # ---- XLA prologue: node LayerNorm + fused QKV projection ----------------
    h0 = _layernorm(feat, p["gn0"], p["bn0"])
    qkv = jnp.dot(h0.astype(bf16), wqkv, preferred_element_type=f32) + bqkv   # (N, 3D)
    q = qkv[:, :D]                        # per-destination
    kv = qkv[:, D:]                       # per-source (k | v)

    # ---- main kernel: attention + online edge softmax + both residual MLPs --
    edge3 = edge.reshape(N, N, H)         # free row-major reshape (src, dst, H)
    Td = dst_tile if dst_tile is not None else _pick_tile(N, prefer_multi=True)
    Sc = src_chunk if src_chunk is not None else _pick_tile(N, prefer_multi=False)
    assert N % Td == 0 and (Td % 8 == 0 or Td == N)
    assert N % Sc == 0 and (Sc % 8 == 0 or Sc == N)
    grid = (N // Td, N // Sc)             # (dst tiles [parallel], src chunks [arbitrary])

    def wspec(a):
        nd = a.ndim
        return pl.BlockSpec(a.shape, lambda j, s, _nd=nd: (0,) * _nd)

    dst_nodes = pl.BlockSpec((Td, D), lambda j, s: (j, 0))
    src_kv = pl.BlockSpec((Sc, 2 * D), lambda j, s: (s, 0))
    edge_blk = pl.BlockSpec((Sc, Td, H), lambda j, s: (s, j, 0))

    in_specs = [
        dst_nodes,                        # q    (dst tile)
        src_kv,                           # k|v  (src chunk)
        dst_nodes,                        # feat (dst tile, residual)
        edge_blk,                         # edge block
        wspec(hm_bf), wspec(hmt),
        wspec(p["ge0"]), wspec(p["be0"]), wspec(web), wspec(beb),
        wspec(wvv_v), wspec(wvv_e), wspec(p["bvv"]),
        pl.BlockSpec(memory_space=pltpu.MemorySpace.SMEM),   # scalar gate w
        wspec(p["gm"]), wspec(p["bm"]),
        wspec(wm0), wspec(p["bm0"]), wspec(wm1), wspec(p["bm1"]),
        wspec(p["ge1"]), wspec(p["be1"]),
        wspec(wf0), wspec(p["bf0"]), wspec(wf1), wspec(p["bf1"]),
    ]
    out_specs = (
        pl.BlockSpec((Td, D), lambda j, s: (j, 0)),           # h_out (resident over src)
        edge_blk,                                             # e_out (per step)
    )
    scratch_shapes = [
        pltpu.VMEM((Td, H), jnp.float32),   # running max m
        pltpu.VMEM((Td, H), jnp.float32),   # running sum l
        pltpu.VMEM((Td, D), jnp.float32),   # acc of att * v_src (head-interleaved)
        pltpu.VMEM((Td, H), jnp.float32),   # acc of att * edge_v
    ]

    h_out, e_out3 = pl.pallas_call(
        egt_main_kernel,
        out_shape=(jax.ShapeDtypeStruct((N, D), feat.dtype),
                   jax.ShapeDtypeStruct((N, N, H), edge.dtype)),
        grid=grid,
        in_specs=in_specs,
        out_specs=out_specs,
        scratch_shapes=scratch_shapes,
        input_output_aliases={3: 1},      # reuse the edge HBM buffer for e_out
        compiler_params=pltpu.CompilerParams(
            dimension_semantics=("parallel", "arbitrary"),
            vmem_limit_bytes=_vmem_limit_bytes()),
    )(q, kv, feat, edge3,
      hm_bf, hmt,
      p["ge0"], p["be0"], web, beb,
      wvv_v, wvv_e, p["bvv"], p["w"], p["gm"], p["bm"],
      wm0, p["bm0"], wm1, p["bm1"],
      p["ge1"], p["be1"], wf0, p["bf0"], wf1, p["bf1"])

    return h_out, e_out3.reshape(E, H)


# ------------------------------------------------------------------ reference

def egt_reference(feat, edge, p):
    """Pure-JAX (f32) mirror of the PyTorch EGT forward, dense graph."""
    N, D = feat.shape
    H = D // 3
    hd = D // H
    h0 = _layernorm(feat, p["gn0"], p["bn0"])
    ew = _layernorm(edge, p["ge0"], p["be0"])
    q = (h0 @ p["wq"] + p["bq"]).reshape(N, H, hd)
    k = (h0 @ p["wk"] + p["bk"]).reshape(N, H, hd)
    v = (h0 @ p["wv"] + p["bv"]).reshape(N, H, hd)
    ev = (ew @ p["we"] + p["bee"]).reshape(N * N, H, 1)
    B = ew @ p["wb"] + p["bbb"]                                   # (E, H)
    # edge e = src*N + dst
    score = jnp.einsum('shd,thd->sth', k, q).reshape(N * N, H)    # k_src . q_dst
    score = score / 2.0 + B
    e = score + edge
    se = jnp.concatenate([jnp.repeat(v, N, axis=0).reshape(N, N, H, hd),
                          ev.reshape(N, N, H, 1)], axis=-1)       # (src, dst, H, hd+1)
    att3 = jax.nn.softmax(score.reshape(N, N, H), axis=0)         # softmax over sources
    agg = jnp.sum(att3[..., None] * se, axis=0)                   # (dst, H, hd+1)
    h = feat * (1.0 + p["w"][0, 0]) + (agg.reshape(N, -1) @ p["wvv"] + p["bvv"])
    hn = _layernorm(h, p["gm"], p["bm"])
    h = h + (jnp.maximum(hn @ p["wm0"] + p["bm0"], 0.0) @ p["wm1"] + p["bm1"])
    en = _layernorm(e, p["ge1"], p["be1"])
    e = e + (jnp.maximum(en @ p["wf0"] + p["bf0"], 0.0) @ p["wf1"] + p["bf1"])
    return h, e


# ------------------------------------------------------------------ params

def init_params(key, dim):
    """Deterministic synthetic init mirroring the module's parameter shapes
    (xavier-uniform weights, small uniform biases, unit LayerNorm, w = 0)."""
    H = dim // 3

    def xavier(k, fin, fout):
        lim = math.sqrt(6.0 / (fin + fout))
        return jax.random.uniform(k, (fin, fout), jnp.float32, -lim, lim)

    def bias(k, fout):
        lim = 1.0 / math.sqrt(max(fout, 1))
        return jax.random.uniform(k, (1, fout), jnp.float32, -lim, lim)

    ks = jax.random.split(key, 20)
    p = {
        "wq": xavier(ks[0], dim, dim), "bq": bias(ks[1], dim),
        "wk": xavier(ks[2], dim, dim), "bk": bias(ks[3], dim),
        "wv": xavier(ks[4], dim, dim), "bv": bias(ks[5], dim),
        "wvv": xavier(ks[6], dim + H, dim), "bvv": bias(ks[7], dim),
        "we": xavier(ks[8], H, H), "bee": bias(ks[9], H),
        "wb": xavier(ks[10], H, H), "bbb": bias(ks[11], H),
        "wf0": xavier(ks[12], H, 2 * H), "bf0": bias(ks[13], 2 * H),
        "wf1": xavier(ks[14], 2 * H, H), "bf1": bias(ks[15], H),
        "wm0": xavier(ks[16], dim, 2 * dim), "bm0": bias(ks[17], 2 * dim),
        "wm1": xavier(ks[18], 2 * dim, dim), "bm1": bias(ks[19], dim),
        "gn0": jnp.ones((1, dim), jnp.float32), "bn0": jnp.zeros((1, dim), jnp.float32),
        "ge0": jnp.ones((1, H), jnp.float32), "be0": jnp.zeros((1, H), jnp.float32),
        "ge1": jnp.ones((1, H), jnp.float32), "be1": jnp.zeros((1, H), jnp.float32),
        "gm": jnp.ones((1, dim), jnp.float32), "bm": jnp.zeros((1, dim), jnp.float32),
        "w": jnp.zeros((1, 1), jnp.float32),   # nn.Parameter(torch.zeros(1))
    }
    return p


# ------------------------------------------------------------------ main

if __name__ == "__main__":
    key = jax.random.PRNGKey(0)
    N, dim = 16, 48                   # dim divisible by 3 -> num_heads = 16, head_dim = 3
    H = dim // 3
    E = N * N                         # dense complete graph

    kf, ke, kp = jax.random.split(key, 3)
    feat = jax.random.normal(kf, (N, dim), jnp.float32)
    edge = jax.random.normal(ke, (E, H), jnp.float32)
    params = init_params(kp, dim)

    # Reference FIRST: `edge` is donated to the Pallas call below (in-place e_out).
    h_ref, e_ref = egt_reference(feat, edge, params)
    jax.block_until_ready((h_ref, e_ref))

    fwd = jax.jit(egt_forward, donate_argnums=(1,),
                  static_argnames=("dst_tile", "src_chunk"))
    # Small tiles to exercise the 2x2 grid (2 dst tiles x 2 source chunks =>
    # megacore split + the online-softmax accumulation path).
    h_out, e_out = fwd(feat, edge, params, dst_tile=8, src_chunk=8)
    jax.block_until_ready((h_out, e_out))

    assert h_out.shape == (N, dim) and h_out.dtype == jnp.float32
    assert e_out.shape == (E, H) and e_out.dtype == jnp.float32
    assert bool(jnp.all(jnp.isfinite(h_out))) and bool(jnp.all(jnp.isfinite(e_out)))
    err_h = float(jnp.max(jnp.abs(h_out - h_ref)))
    err_e = float(jnp.max(jnp.abs(e_out - e_ref)))
    # bf16 operands + approx reciprocal => loose tripwire tolerance.
    assert err_h < 0.25 and err_e < 0.25, (err_h, err_e)
    print("KERNEL_OK")
</pallas_src>

<mosaic_0001>
module attributes {stable_mosaic.version = 11 : i64} {
  func.func @egt_main_kernel(%arg0: i32, %arg1: i32, %arg2: memref<8x48xf32, #tpu.memory_space<vmem>>, %arg3: memref<8x96xf32, #tpu.memory_space<vmem>>, %arg4: memref<8x48xf32, #tpu.memory_space<vmem>>, %arg5: memref<8x8x16xf32, #tpu.memory_space<vmem>>, %arg6: memref<48x16xbf16, #tpu.memory_space<vmem>>, %arg7: memref<16x48xf32, #tpu.memory_space<vmem>>, %arg8: memref<1x16xf32, #tpu.memory_space<vmem>>, %arg9: memref<1x16xf32, #tpu.memory_space<vmem>>, %arg10: memref<16x32xbf16, #tpu.memory_space<vmem>>, %arg11: memref<1x32xf32, #tpu.memory_space<vmem>>, %arg12: memref<48x48xbf16, #tpu.memory_space<vmem>>, %arg13: memref<16x48xbf16, #tpu.memory_space<vmem>>, %arg14: memref<1x48xf32, #tpu.memory_space<vmem>>, %arg15: memref<1x1xf32, #tpu.memory_space<smem>>, %arg16: memref<1x48xf32, #tpu.memory_space<vmem>>, %arg17: memref<1x48xf32, #tpu.memory_space<vmem>>, %arg18: memref<48x96xbf16, #tpu.memory_space<vmem>>, %arg19: memref<1x96xf32, #tpu.memory_space<vmem>>, %arg20: memref<96x48xbf16, #tpu.memory_space<vmem>>, %arg21: memref<1x48xf32, #tpu.memory_space<vmem>>, %arg22: memref<1x16xf32, #tpu.memory_space<vmem>>, %arg23: memref<1x16xf32, #tpu.memory_space<vmem>>, %arg24: memref<16x32xbf16, #tpu.memory_space<vmem>>, %arg25: memref<1x32xf32, #tpu.memory_space<vmem>>, %arg26: memref<32x16xbf16, #tpu.memory_space<vmem>>, %arg27: memref<1x16xf32, #tpu.memory_space<vmem>>, %arg28: memref<8x48xf32, #tpu.memory_space<vmem>>, %arg29: memref<8x8x16xf32, #tpu.memory_space<vmem>>, %arg30: memref<8x16xf32, #tpu.memory_space<vmem>>, %arg31: memref<8x16xf32, #tpu.memory_space<vmem>>, %arg32: memref<8x48xf32, #tpu.memory_space<vmem>>, %arg33: memref<8x16xf32, #tpu.memory_space<vmem>>) attributes {dimension_semantics = [#tpu.dimension_semantics<parallel>, #tpu.dimension_semantics<arbitrary>], iteration_bounds = array<i64: 2, 2>, scalar_prefetch = 0 : i64, scratch_operands = 4 : i64, tpu.core_type = #tpu.core_type<tc>, window_params = [{transform_indices = @transform_0, window_bounds = array<i64: 8, 48>}, {transform_indices = @transform_1, window_bounds = array<i64: 8, 96>}, {transform_indices = @transform_2, window_bounds = array<i64: 8, 48>}, {transform_indices = @transform_3, window_bounds = array<i64: 8, 8, 16>}, {pipeline_mode = #tpu.pipeline_mode<synchronous>, transform_indices = @transform_4, window_bounds = array<i64: 48, 16>}, {pipeline_mode = #tpu.pipeline_mode<synchronous>, transform_indices = @transform_5, window_bounds = array<i64: 16, 48>}, {pipeline_mode = #tpu.pipeline_mode<synchronous>, transform_indices = @transform_6, window_bounds = array<i64: 1, 16>}, {pipeline_mode = #tpu.pipeline_mode<synchronous>, transform_indices = @transform_7, window_bounds = array<i64: 1, 16>}, {pipeline_mode = #tpu.pipeline_mode<synchronous>, transform_indices = @transform_8, window_bounds = array<i64: 16, 32>}, {pipeline_mode = #tpu.pipeline_mode<synchronous>, transform_indices = @transform_9, window_bounds = array<i64: 1, 32>}, {pipeline_mode = #tpu.pipeline_mode<synchronous>, transform_indices = @transform_10, window_bounds = array<i64: 48, 48>}, {pipeline_mode = #tpu.pipeline_mode<synchronous>, transform_indices = @transform_11, window_bounds = array<i64: 16, 48>}, {pipeline_mode = #tpu.pipeline_mode<synchronous>, transform_indices = @transform_12, window_bounds = array<i64: 1, 48>}, {transform_indices = @transform_13, window_bounds = array<i64: 1, 1>}, {pipeline_mode = #tpu.pipeline_mode<synchronous>, transform_indices = @transform_14, window_bounds = array<i64: 1, 48>}, {pipeline_mode = #tpu.pipeline_mode<synchronous>, transform_indices = @transform_15, window_bounds = array<i64: 1, 48>}, {pipeline_mode = #tpu.pipeline_mode<synchronous>, transform_indices = @transform_16, window_bounds = array<i64: 48, 96>}, {pipeline_mode = #tpu.pipeline_mode<synchronous>, transform_indices = @transform_17, window_bounds = array<i64: 1, 96>}, {pipeline_mode = #tpu.pipeline_mode<synchronous>, transform_indices = @transform_18, window_bounds = array<i64: 96, 48>}, {pipeline_mode = #tpu.pipeline_mode<synchronous>, transform_indices = @transform_19, window_bounds = array<i64: 1, 48>}, {pipeline_mode = #tpu.pipeline_mode<synchronous>, transform_indices = @transform_20, window_bounds = array<i64: 1, 16>}, {pipeline_mode = #tpu.pipeline_mode<synchronous>, transform_indices = @transform_21, window_bounds = array<i64: 1, 16>}, {pipeline_mode = #tpu.pipeline_mode<synchronous>, transform_indices = @transform_22, window_bounds = array<i64: 16, 32>}, {pipeline_mode = #tpu.pipeline_mode<synchronous>, transform_indices = @transform_23, window_bounds = array<i64: 1, 32>}, {pipeline_mode = #tpu.pipeline_mode<synchronous>, transform_indices = @transform_24, window_bounds = array<i64: 32, 16>}, {pipeline_mode = #tpu.pipeline_mode<synchronous>, transform_indices = @transform_25, window_bounds = array<i64: 1, 16>}, {transform_indices = @transform_26, window_bounds = array<i64: 8, 48>}, {transform_indices = @transform_27, window_bounds = array<i64: 8, 8, 16>}]} {
    %c0_i32 = arith.constant 0 : i32
    %0 = arith.cmpi eq, %arg1, %c0_i32 : i32
    %1 = arith.extui %0 : i1 to i32
    %c0_i32_0 = arith.constant 0 : i32
    %2 = arith.cmpi ne, %1, %c0_i32_0 : i32
    scf.if %2 {
      %cst_72 = arith.constant 0xFF800000 : f32
      %138 = vector.broadcast %cst_72 : f32 to vector<8x16xf32>
      %c0_73 = arith.constant 0 : index
      %c0_74 = arith.constant 0 : index
      %139 = vector.load %arg30[%c0_73, %c0_74] : memref<8x16xf32, #tpu.memory_space<vmem>>, vector<8x16xf32>
      tpu.vector_store %arg30[%c0_73, %c0_74], %138 {strides = array<i32>} : memref<8x16xf32, #tpu.memory_space<vmem>>, vector<8x16xf32>,
      %cst_75 = arith.constant 0.000000e+00 : f32
      %140 = vector.broadcast %cst_75 : f32 to vector<8x16xf32>
      %c0_76 = arith.constant 0 : index
      %c0_77 = arith.constant 0 : index
      %141 = vector.load %arg31[%c0_76, %c0_77] : memref<8x16xf32, #tpu.memory_space<vmem>>, vector<8x16xf32>
      tpu.vector_store %arg31[%c0_76, %c0_77], %140 {strides = array<i32>} : memref<8x16xf32, #tpu.memory_space<vmem>>, vector<8x16xf32>,
      %cst_78 = arith.constant 0.000000e+00 : f32
      %142 = vector.broadcast %cst_78 : f32 to vector<8x48xf32>
      %c0_79 = arith.constant 0 : index
      %c0_80 = arith.constant 0 : index
      %143 = vector.load %arg32[%c0_79, %c0_80] : memref<8x48xf32, #tpu.memory_space<vmem>>, vector<8x48xf32>
      tpu.vector_store %arg32[%c0_79, %c0_80], %142 {strides = array<i32>} : memref<8x48xf32, #tpu.memory_space<vmem>>, vector<8x48xf32>,
      %cst_81 = arith.constant 0.000000e+00 : f32
      %144 = vector.broadcast %cst_81 : f32 to vector<8x16xf32>
      %c0_82 = arith.constant 0 : index
      %c0_83 = arith.constant 0 : index
      %145 = vector.load %arg33[%c0_82, %c0_83] : memref<8x16xf32, #tpu.memory_space<vmem>>, vector<8x16xf32>
      tpu.vector_store %arg33[%c0_82, %c0_83], %144 {strides = array<i32>} : memref<8x16xf32, #tpu.memory_space<vmem>>, vector<8x16xf32>,
    } else {
    }
    %c0 = arith.constant 0 : index
    %c0_1 = arith.constant 0 : index
    %c0_2 = arith.constant 0 : index
    %3 = vector.load %arg5[%c0, %c0_1, %c0_2] : memref<8x8x16xf32, #tpu.memory_space<vmem>>, vector<8x8x16xf32>
    %4 = vector.shape_cast %3 : vector<8x8x16xf32> to vector<64x16xf32>
    %c0_3 = arith.constant 0 : index
    %c0_4 = arith.constant 0 : index
    %5 = vector.load %arg8[%c0_3, %c0_4] : memref<1x16xf32, #tpu.memory_space<vmem>>, vector<1x16xf32>
    %c0_5 = arith.constant 0 : index
    %c0_6 = arith.constant 0 : index
    %6 = vector.load %arg9[%c0_5, %c0_6] : memref<1x16xf32, #tpu.memory_space<vmem>>, vector<1x16xf32>
    %cst = arith.constant dense<0.000000e+00> : vector<64xf32>
    %7 = vector.multi_reduction <add>, %4, %cst [1] : vector<64x16xf32> to vector<64xf32>
    %8 = vector.shape_cast %7 : vector<64xf32> to vector<64x1xf32>
    %cst_7 = arith.constant 1.600000e+01 : f32
    %9 = vector.broadcast %cst_7 : f32 to vector<64x1xf32>
    %10 = arith.divf %8, %9 : vector<64x1xf32>
    %11 = vector.broadcast %10 : vector<64x1xf32> to vector<64x16xf32>
    %12 = arith.subf %4, %11 : vector<64x16xf32>
    %13 = arith.mulf %12, %12 : vector<64x16xf32>
    %cst_8 = arith.constant dense<0.000000e+00> : vector<64xf32>
    %14 = vector.multi_reduction <add>, %13, %cst_8 [1] : vector<64x16xf32> to vector<64xf32>
    %15 = vector.shape_cast %14 : vector<64xf32> to vector<64x1xf32>
    %cst_9 = arith.constant 1.600000e+01 : f32
    %16 = vector.broadcast %cst_9 : f32 to vector<64x1xf32>
    %17 = arith.divf %15, %16 : vector<64x1xf32>
    %18 = vector.broadcast %10 : vector<64x1xf32> to vector<64x16xf32>
    %19 = arith.subf %4, %18 : vector<64x16xf32>
    %cst_10 = arith.constant 9.99999974E-6 : f32
    %20 = vector.broadcast %cst_10 : f32 to vector<64x1xf32>
    %21 = arith.addf %17, %20 : vector<64x1xf32>
    %22 = math.rsqrt %21 : vector<64x1xf32>
    %23 = vector.broadcast %22 : vector<64x1xf32> to vector<64x16xf32>
    %24 = arith.mulf %19, %23 : vector<64x16xf32>
    %25 = vector.broadcast %5 : vector<1x16xf32> to vector<64x16xf32>
    %26 = arith.mulf %24, %25 : vector<64x16xf32>
    %27 = vector.broadcast %6 : vector<1x16xf32> to vector<64x16xf32>
    %28 = arith.addf %26, %27 : vector<64x16xf32>
    %29 = arith.truncf %28 : vector<64x16xf32> to vector<64x16xbf16>
    %c0_11 = arith.constant 0 : index
    %c0_12 = arith.constant 0 : index
    %30 = vector.load %arg10[%c0_11, %c0_12] : memref<16x32xbf16, #tpu.memory_space<vmem>>, vector<16x32xbf16>
    %cst_13 = arith.constant dense<0.000000e+00> : vector<64x32xf32>
    %31 = tpu.matmul %29, %30, %cst_13 {dimension_numbers = #tpu.dot_dimension_numbers<[1], [0], [0], [1], [0, 0, 1, 1], [], []>} : vector<64x16xbf16>, vector<16x32xbf16>, vector<64x32xf32> -> vector<64x32xf32>
    %c0_14 = arith.constant 0 : index
    %c0_15 = arith.constant 0 : index
    %32 = vector.load %arg11[%c0_14, %c0_15] : memref<1x32xf32, #tpu.memory_space<vmem>>, vector<1x32xf32>
    %33 = vector.broadcast %32 : vector<1x32xf32> to vector<64x32xf32>
    %34 = arith.addf %31, %33 : vector<64x32xf32>
    %35 = vector.extract_strided_slice %34 {offsets = [0, 0], sizes = [64, 16], strides = [1, 1]} : vector<64x32xf32> to vector<64x16xf32>
    %36 = vector.shape_cast %35 : vector<64x16xf32> to vector<8x8x16xf32>
    %37 = vector.extract_strided_slice %34 {offsets = [0, 16], sizes = [64, 16], strides = [1, 1]} : vector<64x32xf32> to vector<64x16xf32>
    %38 = vector.shape_cast %37 : vector<64x16xf32> to vector<8x8x16xf32>
    %c0_16 = arith.constant 0 : index
    %c0_17 = arith.constant 0 : index
    %39 = vector.load %arg2[%c0_16, %c0_17] : memref<8x48xf32, #tpu.memory_space<vmem>>, vector<8x48xf32>
    %c0_18 = arith.constant 0 : index
    %c0_19 = arith.constant 0 : index
    %40 = vector.load %arg3[%c0_18, %c0_19] : memref<8x96xf32, #tpu.memory_space<vmem>>, vector<8x96xf32>
    %41 = vector.extract_strided_slice %40 {offsets = [0, 0], sizes = [8, 48], strides = [1, 1]} : vector<8x96xf32> to vector<8x48xf32>
    %42 = vector.extract_strided_slice %40 {offsets = [0, 48], sizes = [8, 48], strides = [1, 1]} : vector<8x96xf32> to vector<8x48xf32>
    %43 = vector.shape_cast %41 : vector<8x48xf32> to vector<8x1x48xf32>
    %44 = vector.shape_cast %39 : vector<8x48xf32> to vector<1x8x48xf32>
    %45 = vector.broadcast %43 : vector<8x1x48xf32> to vector<8x8x48xf32>
    %46 = vector.broadcast %44 : vector<1x8x48xf32> to vector<8x8x48xf32>
    %47 = arith.mulf %45, %46 : vector<8x8x48xf32>
    %48 = arith.truncf %47 : vector<8x8x48xf32> to vector<8x8x48xbf16>
    %49 = vector.shape_cast %48 : vector<8x8x48xbf16> to vector<64x48xbf16>
    %c0_20 = arith.constant 0 : index
    %c0_21 = arith.constant 0 : index
    %50 = vector.load %arg6[%c0_20, %c0_21] : memref<48x16xbf16, #tpu.memory_space<vmem>>, vector<48x16xbf16>
    %cst_22 = arith.constant dense<0.000000e+00> : vector<64x16xf32>
    %51 = tpu.matmul %49, %50, %cst_22 {dimension_numbers = #tpu.dot_dimension_numbers<[1], [0], [0], [1], [0, 0, 1, 1], [], []>} : vector<64x48xbf16>, vector<48x16xbf16>, vector<64x16xf32> -> vector<64x16xf32>
    %52 = vector.shape_cast %51 : vector<64x16xf32> to vector<8x8x16xf32>
    %cst_23 = arith.constant 5.000000e-01 : f32
    %53 = vector.broadcast %cst_23 : f32 to vector<8x8x16xf32>
    %54 = arith.mulf %52, %53 : vector<8x8x16xf32>
    %55 = arith.addf %54, %38 : vector<8x8x16xf32>
    %56 = arith.addf %55, %3 : vector<8x8x16xf32>
    %c0_24 = arith.constant 0 : index
    %c0_25 = arith.constant 0 : index
    %57 = vector.load %arg7[%c0_24, %c0_25] : memref<16x48xf32, #tpu.memory_space<vmem>>, vector<16x48xf32>
    %c0_26 = arith.constant 0 : index
    %c0_27 = arith.constant 0 : index
    %58 = vector.load %arg30[%c0_26, %c0_27] : memref<8x16xf32, #tpu.memory_space<vmem>>, vector<8x16xf32>
    %cst_28 = arith.constant dense<0xFF800000> : vector<8x16xf32>
    %59 = vector.multi_reduction <maximumf>, %55, %cst_28 [0] : vector<8x8x16xf32> to vector<8x16xf32>
    %60 = arith.maximumf %58, %59 : vector<8x16xf32>
    %61 = arith.subf %58, %60 : vector<8x16xf32>
    %62 = math.exp %61 : vector<8x16xf32>
    %63 = vector.shape_cast %60 : vector<8x16xf32> to vector<1x8x16xf32>
    %64 = vector.broadcast %63 : vector<1x8x16xf32> to vector<8x8x16xf32>
    %65 = arith.subf %55, %64 : vector<8x8x16xf32>
    %66 = math.exp %65 : vector<8x8x16xf32>
    %c0_29 = arith.constant 0 : index
    %c0_30 = arith.constant 0 : index
    %67 = vector.load %arg31[%c0_29, %c0_30] : memref<8x16xf32, #tpu.memory_space<vmem>>, vector<8x16xf32>
    %68 = arith.mulf %62, %67 : vector<8x16xf32>
    %cst_31 = arith.constant dense<0.000000e+00> : vector<8x16xf32>
    %69 = vector.multi_reduction <add>, %66, %cst_31 [0] : vector<8x8x16xf32> to vector<8x16xf32>
    %70 = arith.addf %68, %69 : vector<8x16xf32>
    %c0_32 = arith.constant 0 : index
    %c0_33 = arith.constant 0 : index
    %71 = vector.load %arg31[%c0_32, %c0_33] : memref<8x16xf32, #tpu.memory_space<vmem>>, vector<8x16xf32>
    tpu.vector_store %arg31[%c0_32, %c0_33], %70 {strides = array<i32>} : memref<8x16xf32, #tpu.memory_space<vmem>>, vector<8x16xf32>,
    %72 = vector.shape_cast %66 : vector<8x8x16xf32> to vector<64x16xf32>
    %73 = arith.truncf %72 : vector<64x16xf32> to vector<64x16xbf16>
    %74 = arith.truncf %57 : vector<16x48xf32> to vector<16x48xbf16>
    %cst_34 = arith.constant dense<0.000000e+00> : vector<64x48xf32>
    %75 = tpu.matmul %73, %74, %cst_34 {dimension_numbers = #tpu.dot_dimension_numbers<[1], [0], [0], [1], [0, 0, 1, 1], [], []>} : vector<64x16xbf16>, vector<16x48xbf16>, vector<64x48xf32> -> vector<64x48xf32>
    %76 = vector.shape_cast %75 : vector<64x48xf32> to vector<8x8x48xf32>
    %cst_35 = arith.constant dense<0.000000e+00> : vector<8x48xf32>
    %77 = tpu.matmul %62, %57, %cst_35 {dimension_numbers = #tpu.dot_dimension_numbers<[1], [0], [0], [1], [0, 0, 1, 1], [], []>} : vector<8x16xf32>, vector<16x48xf32>, vector<8x48xf32> -> vector<8x48xf32>
    %c0_36 = arith.constant 0 : index
    %c0_37 = arith.constant 0 : index
    %78 = vector.load %arg32[%c0_36, %c0_37] : memref<8x48xf32, #tpu.memory_space<vmem>>, vector<8x48xf32>
    %79 = arith.mulf %77, %78 : vector<8x48xf32>
    %80 = vector.shape_cast %42 : vector<8x48xf32> to vector<8x1x48xf32>
    %81 = vector.broadcast %80 : vector<8x1x48xf32> to vector<8x8x48xf32>
    %82 = arith.mulf %76, %81 : vector<8x8x48xf32>
    %cst_38 = arith.constant dense<0.000000e+00> : vector<8x48xf32>
    %83 = vector.multi_reduction <add>, %82, %cst_38 [0] : vector<8x8x48xf32> to vector<8x48xf32>
    %84 = arith.addf %79, %83 : vector<8x48xf32>
    %c0_39 = arith.constant 0 : index
    %c0_40 = arith.constant 0 : index
    %85 = vector.load %arg32[%c0_39, %c0_40] : memref<8x48xf32, #tpu.memory_space<vmem>>, vector<8x48xf32>
    tpu.vector_store %arg32[%c0_39, %c0_40], %84 {strides = array<i32>} : memref<8x48xf32, #tpu.memory_space<vmem>>, vector<8x48xf32>,
    %c0_41 = arith.constant 0 : index
    %c0_42 = arith.constant 0 : index
    %86 = vector.load %arg33[%c0_41, %c0_42] : memref<8x16xf32, #tpu.memory_space<vmem>>, vector<8x16xf32>
    %87 = arith.mulf %62, %86 : vector<8x16xf32>
    %88 = arith.mulf %66, %36 : vector<8x8x16xf32>
    %cst_43 = arith.constant dense<0.000000e+00> : vector<8x16xf32>
    %89 = vector.multi_reduction <add>, %88, %cst_43 [0] : vector<8x8x16xf32> to vector<8x16xf32>
    %90 = arith.addf %87, %89 : vector<8x16xf32>
    %c0_44 = arith.constant 0 : index
    %c0_45 = arith.constant 0 : index
    %91 = vector.load %arg33[%c0_44, %c0_45] : memref<8x16xf32, #tpu.memory_space<vmem>>, vector<8x16xf32>
    tpu.vector_store %arg33[%c0_44, %c0_45], %90 {strides = array<i32>} : memref<8x16xf32, #tpu.memory_space<vmem>>, vector<8x16xf32>,
    %c0_46 = arith.constant 0 : index
    %c0_47 = arith.constant 0 : index
    %92 = vector.load %arg30[%c0_46, %c0_47] : memref<8x16xf32, #tpu.memory_space<vmem>>, vector<8x16xf32>
    tpu.vector_store %arg30[%c0_46, %c0_47], %60 {strides = array<i32>} : memref<8x16xf32, #tpu.memory_space<vmem>>, vector<8x16xf32>,
    %c1_i32 = arith.constant 1 : i32
    %93 = arith.cmpi eq, %arg1, %c1_i32 : i32
    %94 = arith.extui %93 : i1 to i32
    %c0_i32_48 = arith.constant 0 : i32
    %95 = arith.cmpi ne, %94, %c0_i32_48 : i32
    scf.if %95 {
      %c0_72 = arith.constant 0 : index
      %c0_73 = arith.constant 0 : index
      %138 = vector.load %arg31[%c0_72, %c0_73] : memref<8x16xf32, #tpu.memory_space<vmem>>, vector<8x16xf32>
      %139 = tpu.reciprocal %138 {approx = true} : vector<8x16xf32> -> vector<8x16xf32>
      %cst_74 = arith.constant dense<0.000000e+00> : vector<8x48xf32>
      %140 = tpu.matmul %139, %57, %cst_74 {dimension_numbers = #tpu.dot_dimension_numbers<[1], [0], [0], [1], [0, 0, 1, 1], [], []>} : vector<8x16xf32>, vector<16x48xf32>, vector<8x48xf32> -> vector<8x48xf32>
      %c0_75 = arith.constant 0 : index
      %c0_76 = arith.constant 0 : index
      %141 = vector.load %arg32[%c0_75, %c0_76] : memref<8x48xf32, #tpu.memory_space<vmem>>, vector<8x48xf32>
      %142 = arith.mulf %141, %140 : vector<8x48xf32>
      %c0_77 = arith.constant 0 : index
      %c0_78 = arith.constant 0 : index
      %143 = vector.load %arg33[%c0_77, %c0_78] : memref<8x16xf32, #tpu.memory_space<vmem>>, vector<8x16xf32>
      %144 = arith.mulf %143, %139 : vector<8x16xf32>
      %145 = arith.truncf %142 : vector<8x48xf32> to vector<8x48xbf16>
      %c0_79 = arith.constant 0 : index
      %c0_80 = arith.constant 0 : index
      %146 = vector.load %arg12[%c0_79, %c0_80] : memref<48x48xbf16, #tpu.memory_space<vmem>>, vector<48x48xbf16>
      %cst_81 = arith.constant dense<0.000000e+00> : vector<8x48xf32>
      %147 = tpu.matmul %145, %146, %cst_81 {dimension_numbers = #tpu.dot_dimension_numbers<[1], [0], [0], [1], [0, 0, 1, 1], [], []>} : vector<8x48xbf16>, vector<48x48xbf16>, vector<8x48xf32> -> vector<8x48xf32>
      %148 = arith.truncf %144 : vector<8x16xf32> to vector<8x16xbf16>
      %c0_82 = arith.constant 0 : index
      %c0_83 = arith.constant 0 : index
      %149 = vector.load %arg13[%c0_82, %c0_83] : memref<16x48xbf16, #tpu.memory_space<vmem>>, vector<16x48xbf16>
      %cst_84 = arith.constant dense<0.000000e+00> : vector<8x48xf32>
      %150 = tpu.matmul %148, %149, %cst_84 {dimension_numbers = #tpu.dot_dimension_numbers<[1], [0], [0], [1], [0, 0, 1, 1], [], []>} : vector<8x16xbf16>, vector<16x48xbf16>, vector<8x48xf32> -> vector<8x48xf32>
      %151 = arith.addf %147, %150 : vector<8x48xf32>
      %c0_85 = arith.constant 0 : index
      %c0_86 = arith.constant 0 : index
      %152 = vector.load %arg14[%c0_85, %c0_86] : memref<1x48xf32, #tpu.memory_space<vmem>>, vector<1x48xf32>
      %153 = vector.broadcast %152 : vector<1x48xf32> to vector<8x48xf32>
      %154 = arith.addf %151, %153 : vector<8x48xf32>
      %c0_87 = arith.constant 0 : index
      %c0_88 = arith.constant 0 : index
      %155 = vector.load %arg4[%c0_87, %c0_88] : memref<8x48xf32, #tpu.memory_space<vmem>>, vector<8x48xf32>
      %c0_89 = arith.constant 0 : index
      %c0_90 = arith.constant 0 : index
      %156 = memref.load %arg15[%c0_89, %c0_90] : memref<1x1xf32, #tpu.memory_space<smem>>
      %cst_91 = arith.constant 1.000000e+00 : f32
      %157 = arith.addf %cst_91, %156 : f32
      %158 = vector.broadcast %157 : f32 to vector<8x48xf32>
      %159 = arith.mulf %155, %158 : vector<8x48xf32>
      %160 = arith.addf %159, %154 : vector<8x48xf32>
      %c0_92 = arith.constant 0 : index
      %c0_93 = arith.constant 0 : index
      %161 = vector.load %arg16[%c0_92, %c0_93] : memref<1x48xf32, #tpu.memory_space<vmem>>, vector<1x48xf32>
      %c0_94 = arith.constant 0 : index
      %c0_95 = arith.constant 0 : index
      %162 = vector.load %arg17[%c0_94, %c0_95] : memref<1x48xf32, #tpu.memory_space<vmem>>, vector<1x48xf32>
      %cst_96 = arith.constant dense<0.000000e+00> : vector<8xf32>
      %163 = vector.multi_reduction <add>, %160, %cst_96 [1] : vector<8x48xf32> to vector<8xf32>
      %164 = vector.shape_cast %163 : vector<8xf32> to vector<8x1xf32>
      %cst_97 = arith.constant 4.800000e+01 : f32
      %165 = vector.broadcast %cst_97 : f32 to vector<8x1xf32>
      %166 = arith.divf %164, %165 : vector<8x1xf32>
      %167 = vector.broadcast %166 : vector<8x1xf32> to vector<8x48xf32>
      %168 = arith.subf %160, %167 : vector<8x48xf32>
      %169 = arith.mulf %168, %168 : vector<8x48xf32>
      %cst_98 = arith.constant dense<0.000000e+00> : vector<8xf32>
      %170 = vector.multi_reduction <add>, %169, %cst_98 [1] : vector<8x48xf32> to vector<8xf32>
      %171 = vector.shape_cast %170 : vector<8xf32> to vector<8x1xf32>
      %cst_99 = arith.constant 4.800000e+01 : f32
      %172 = vector.broadcast %cst_99 : f32 to vector<8x1xf32>
      %173 = arith.divf %171, %172 : vector<8x1xf32>
      %174 = vector.broadcast %166 : vector<8x1xf32> to vector<8x48xf32>
      %175 = arith.subf %160, %174 : vector<8x48xf32>
      %cst_100 = arith.constant 9.99999974E-6 : f32
      %176 = vector.broadcast %cst_100 : f32 to vector<8x1xf32>
      %177 = arith.addf %173, %176 : vector<8x1xf32>
      %178 = math.rsqrt %177 : vector<8x1xf32>
      %179 = vector.broadcast %178 : vector<8x1xf32> to vector<8x48xf32>
      %180 = arith.mulf %175, %179 : vector<8x48xf32>
      %181 = vector.broadcast %161 : vector<1x48xf32> to vector<8x48xf32>
      %182 = arith.mulf %180, %181 : vector<8x48xf32>
      %183 = vector.broadcast %162 : vector<1x48xf32> to vector<8x48xf32>
      %184 = arith.addf %182, %183 : vector<8x48xf32>
      %185 = arith.truncf %184 : vector<8x48xf32> to vector<8x48xbf16>
      %c0_101 = arith.constant 0 : index
      %c0_102 = arith.constant 0 : index
      %186 = vector.load %arg18[%c0_101, %c0_102] : memref<48x96xbf16, #tpu.memory_space<vmem>>, vector<48x96xbf16>
      %cst_103 = arith.constant dense<0.000000e+00> : vector<8x96xf32>
      %187 = tpu.matmul %185, %186, %cst_103 {dimension_numbers = #tpu.dot_dimension_numbers<[1], [0], [0], [1], [0, 0, 1, 1], [], []>} : vector<8x48xbf16>, vector<48x96xbf16>, vector<8x96xf32> -> vector<8x96xf32>
      %c0_104 = arith.constant 0 : index
      %c0_105 = arith.constant 0 : index
      %188 = vector.load %arg19[%c0_104, %c0_105] : memref<1x96xf32, #tpu.memory_space<vmem>>, vector<1x96xf32>
      %189 = vector.broadcast %188 : vector<1x96xf32> to vector<8x96xf32>
      %190 = arith.addf %187, %189 : vector<8x96xf32>
      %cst_106 = arith.constant 0.000000e+00 : f32
      %191 = vector.broadcast %cst_106 : f32 to vector<8x96xf32>
      %192 = arith.maximumf %190, %191 : vector<8x96xf32>
      %193 = arith.truncf %192 : vector<8x96xf32> to vector<8x96xbf16>
      %c0_107 = arith.constant 0 : index
      %c0_108 = arith.constant 0 : index
      %194 = vector.load %arg20[%c0_107, %c0_108] : memref<96x48xbf16, #tpu.memory_space<vmem>>, vector<96x48xbf16>
      %cst_109 = arith.constant dense<0.000000e+00> : vector<8x48xf32>
      %195 = tpu.matmul %193, %194, %cst_109 {dimension_numbers = #tpu.dot_dimension_numbers<[1], [0], [0], [1], [0, 0, 1, 1], [], []>} : vector<8x96xbf16>, vector<96x48xbf16>, vector<8x48xf32> -> vector<8x48xf32>
      %196 = arith.addf %160, %195 : vector<8x48xf32>
      %c0_110 = arith.constant 0 : index
      %c0_111 = arith.constant 0 : index
      %197 = vector.load %arg21[%c0_110, %c0_111] : memref<1x48xf32, #tpu.memory_space<vmem>>, vector<1x48xf32>
      %198 = vector.broadcast %197 : vector<1x48xf32> to vector<8x48xf32>
      %199 = arith.addf %196, %198 : vector<8x48xf32>
      %c0_112 = arith.constant 0 : index
      %c0_113 = arith.constant 0 : index
      %200 = vector.load %arg28[%c0_112, %c0_113] : memref<8x48xf32, #tpu.memory_space<vmem>>, vector<8x48xf32>
      tpu.vector_store %arg28[%c0_112, %c0_113], %199 {strides = array<i32>} : memref<8x48xf32, #tpu.memory_space<vmem>>, vector<8x48xf32>,
    } else {
    }
    %96 = vector.shape_cast %56 : vector<8x8x16xf32> to vector<64x16xf32>
    %c0_49 = arith.constant 0 : index
    %c0_50 = arith.constant 0 : index
    %97 = vector.load %arg22[%c0_49, %c0_50] : memref<1x16xf32, #tpu.memory_space<vmem>>, vector<1x16xf32>
    %c0_51 = arith.constant 0 : index
    %c0_52 = arith.constant 0 : index
    %98 = vector.load %arg23[%c0_51, %c0_52] : memref<1x16xf32, #tpu.memory_space<vmem>>, vector<1x16xf32>
    %cst_53 = arith.constant dense<0.000000e+00> : vector<64xf32>
    %99 = vector.multi_reduction <add>, %96, %cst_53 [1] : vector<64x16xf32> to vector<64xf32>
    %100 = vector.shape_cast %99 : vector<64xf32> to vector<64x1xf32>
    %cst_54 = arith.constant 1.600000e+01 : f32
    %101 = vector.broadcast %cst_54 : f32 to vector<64x1xf32>
    %102 = arith.divf %100, %101 : vector<64x1xf32>
    %103 = vector.broadcast %102 : vector<64x1xf32> to vector<64x16xf32>
    %104 = arith.subf %96, %103 : vector<64x16xf32>
    %105 = arith.mulf %104, %104 : vector<64x16xf32>
    %cst_55 = arith.constant dense<0.000000e+00> : vector<64xf32>
    %106 = vector.multi_reduction <add>, %105, %cst_55 [1] : vector<64x16xf32> to vector<64xf32>
    %107 = vector.shape_cast %106 : vector<64xf32> to vector<64x1xf32>
    %cst_56 = arith.constant 1.600000e+01 : f32
    %108 = vector.broadcast %cst_56 : f32 to vector<64x1xf32>
    %109 = arith.divf %107, %108 : vector<64x1xf32>
    %110 = vector.broadcast %102 : vector<64x1xf32> to vector<64x16xf32>
    %111 = arith.subf %96, %110 : vector<64x16xf32>
    %cst_57 = arith.constant 9.99999974E-6 : f32
    %112 = vector.broadcast %cst_57 : f32 to vector<64x1xf32>
    %113 = arith.addf %109, %112 : vector<64x1xf32>
    %114 = math.rsqrt %113 : vector<64x1xf32>
    %115 = vector.broadcast %114 : vector<64x1xf32> to vector<64x16xf32>
    %116 = arith.mulf %111, %115 : vector<64x16xf32>
    %117 = vector.broadcast %97 : vector<1x16xf32> to vector<64x16xf32>
    %118 = arith.mulf %116, %117 : vector<64x16xf32>
    %119 = vector.broadcast %98 : vector<1x16xf32> to vector<64x16xf32>
    %120 = arith.addf %118, %119 : vector<64x16xf32>
    %121 = arith.truncf %120 : vector<64x16xf32> to vector<64x16xbf16>
    %c0_58 = arith.constant 0 : index
    %c0_59 = arith.constant 0 : index
    %122 = vector.load %arg24[%c0_58, %c0_59] : memref<16x32xbf16, #tpu.memory_space<vmem>>, vector<16x32xbf16>
    %cst_60 = arith.constant dense<0.000000e+00> : vector<64x32xf32>
    %123 = tpu.matmul %121, %122, %cst_60 {dimension_numbers = #tpu.dot_dimension_numbers<[1], [0], [0], [1], [0, 0, 1, 1], [], []>} : vector<64x16xbf16>, vector<16x32xbf16>, vector<64x32xf32> -> vector<64x32xf32>
    %c0_61 = arith.constant 0 : index
    %c0_62 = arith.constant 0 : index
    %124 = vector.load %arg25[%c0_61, %c0_62] : memref<1x32xf32, #tpu.memory_space<vmem>>, vector<1x32xf32>
    %125 = vector.broadcast %124 : vector<1x32xf32> to vector<64x32xf32>
    %126 = arith.addf %123, %125 : vector<64x32xf32>
    %cst_63 = arith.constant 0.000000e+00 : f32
    %127 = vector.broadcast %cst_63 : f32 to vector<64x32xf32>
    %128 = arith.maximumf %126, %127 : vector<64x32xf32>
    %129 = arith.truncf %128 : vector<64x32xf32> to vector<64x32xbf16>
    %c0_64 = arith.constant 0 : index
    %c0_65 = arith.constant 0 : index
    %130 = vector.load %arg26[%c0_64, %c0_65] : memref<32x16xbf16, #tpu.memory_space<vmem>>, vector<32x16xbf16>
    %cst_66 = arith.constant dense<0.000000e+00> : vector<64x16xf32>
    %131 = tpu.matmul %129, %130, %cst_66 {dimension_numbers = #tpu.dot_dimension_numbers<[1], [0], [0], [1], [0, 0, 1, 1], [], []>} : vector<64x32xbf16>, vector<32x16xbf16>, vector<64x16xf32> -> vector<64x16xf32>
    %132 = arith.addf %96, %131 : vector<64x16xf32>
    %c0_67 = arith.constant 0 : index
    %c0_68 = arith.constant 0 : index
    %133 = vector.load %arg27[%c0_67, %c0_68] : memref<1x16xf32, #tpu.memory_space<vmem>>, vector<1x16xf32>
    %134 = vector.broadcast %133 : vector<1x16xf32> to vector<64x16xf32>
    %135 = arith.addf %132, %134 : vector<64x16xf32>
    %136 = vector.shape_cast %135 : vector<64x16xf32> to vector<8x8x16xf32>
    %c0_69 = arith.constant 0 : index
    %c0_70 = arith.constant 0 : index
    %c0_71 = arith.constant 0 : index
    %137 = vector.load %arg29[%c0_69, %c0_70, %c0_71] : memref<8x8x16xf32, #tpu.memory_space<vmem>>, vector<8x8x16xf32>
    tpu.vector_store %arg29[%c0_69, %c0_70, %c0_71], %136 {strides = array<i32>} : memref<8x8x16xf32, #tpu.memory_space<vmem>>, vector<8x8x16xf32>,
    return
  }
  func.func @transform_0(%arg0: i32, %arg1: i32) -> (i32, i32) {
    %c0_i32 = arith.constant 0 : i32
    %c0_i32_0 = arith.constant 0 : i32
    return %arg0, %c0_i32 : i32, i32
  }
  func.func @transform_1(%arg0: i32, %arg1: i32) -> (i32, i32) {
    %c0_i32 = arith.constant 0 : i32
    %c0_i32_0 = arith.constant 0 : i32
    return %arg1, %c0_i32 : i32, i32
  }
  func.func @transform_2(%arg0: i32, %arg1: i32) -> (i32, i32) {
    %c0_i32 = arith.constant 0 : i32
    %c0_i32_0 = arith.constant 0 : i32
    return %arg0, %c0_i32 : i32, i32
  }
  func.func @transform_3(%arg0: i32, %arg1: i32) -> (i32, i32, i32) {
    %c0_i32 = arith.constant 0 : i32
    %c0_i32_0 = arith.constant 0 : i32
    return %arg1, %arg0, %c0_i32 : i32, i32, i32
  }
  func.func @transform_4(%arg0: i32, %arg1: i32) -> (i32, i32) {
    %c0_i32 = arith.constant 0 : i32
    %c0_i32_0 = arith.constant 0 : i32
    %c0_i32_1 = arith.constant 0 : i32
    return %c0_i32, %c0_i32_0 : i32, i32
  }
  func.func @transform_5(%arg0: i32, %arg1: i32) -> (i32, i32) {
    %c0_i32 = arith.constant 0 : i32
    %c0_i32_0 = arith.constant 0 : i32
    %c0_i32_1 = arith.constant 0 : i32
    return %c0_i32, %c0_i32_0 : i32, i32
  }
  func.func @transform_6(%arg0: i32, %arg1: i32) -> (i32, i32) {
    %c0_i32 = arith.constant 0 : i32
    %c0_i32_0 = arith.constant 0 : i32
    %c0_i32_1 = arith.constant 0 : i32
    return %c0_i32, %c0_i32_0 : i32, i32
  }
  func.func @transform_7(%arg0: i32, %arg1: i32) -> (i32, i32) {
    %c0_i32 = arith.constant 0 : i32
    %c0_i32_0 = arith.constant 0 : i32
    %c0_i32_1 = arith.constant 0 : i32
    return %c0_i32, %c0_i32_0 : i32, i32
  }
  func.func @transform_8(%arg0: i32, %arg1: i32) -> (i32, i32) {
    %c0_i32 = arith.constant 0 : i32
    %c0_i32_0 = arith.constant 0 : i32
    %c0_i32_1 = arith.constant 0 : i32
    return %c0_i32, %c0_i32_0 : i32, i32
  }
  func.func @transform_9(%arg0: i32, %arg1: i32) -> (i32, i32) {
    %c0_i32 = arith.constant 0 : i32
    %c0_i32_0 = arith.constant 0 : i32
    %c0_i32_1 = arith.constant 0 : i32
    return %c0_i32, %c0_i32_0 : i32, i32
  }
  func.func @transform_10(%arg0: i32, %arg1: i32) -> (i32, i32) {
    %c0_i32 = arith.constant 0 : i32
    %c0_i32_0 = arith.constant 0 : i32
    %c0_i32_1 = arith.constant 0 : i32
    return %c0_i32, %c0_i32_0 : i32, i32
  }
  func.func @transform_11(%arg0: i32, %arg1: i32) -> (i32, i32) {
    %c0_i32 = arith.constant 0 : i32
    %c0_i32_0 = arith.constant 0 : i32
    %c0_i32_1 = arith.constant 0 : i32
    return %c0_i32, %c0_i32_0 : i32, i32
  }
  func.func @transform_12(%arg0: i32, %arg1: i32) -> (i32, i32) {
    %c0_i32 = arith.constant 0 : i32
    %c0_i32_0 = arith.constant 0 : i32
    %c0_i32_1 = arith.constant 0 : i32
    return %c0_i32, %c0_i32_0 : i32, i32
  }
  func.func @transform_13(%arg0: i32, %arg1: i32) -> (i32, i32) {
    %c0_i32 = arith.constant 0 : i32
    %c0_i32_0 = arith.constant 0 : i32
    %c0_i32_1 = arith.constant 0 : i32
    return %c0_i32, %c0_i32_0 : i32, i32
  }
  func.func @transform_14(%arg0: i32, %arg1: i32) -> (i32, i32) {
    %c0_i32 = arith.constant 0 : i32
    %c0_i32_0 = arith.constant 0 : i32
    %c0_i32_1 = arith.constant 0 : i32
    return %c0_i32, %c0_i32_0 : i32, i32
  }
  func.func @transform_15(%arg0: i32, %arg1: i32) -> (i32, i32) {
    %c0_i32 = arith.constant 0 : i32
    %c0_i32_0 = arith.constant 0 : i32
    %c0_i32_1 = arith.constant 0 : i32
    return %c0_i32, %c0_i32_0 : i32, i32
  }
  func.func @transform_16(%arg0: i32, %arg1: i32) -> (i32, i32) {
    %c0_i32 = arith.constant 0 : i32
    %c0_i32_0 = arith.constant 0 : i32
    %c0_i32_1 = arith.constant 0 : i32
    return %c0_i32, %c0_i32_0 : i32, i32
  }
  func.func @transform_17(%arg0: i32, %arg1: i32) -> (i32, i32) {
    %c0_i32 = arith.constant 0 : i32
    %c0_i32_0 = arith.constant 0 : i32
    %c0_i32_1 = arith.constant 0 : i32
    return %c0_i32, %c0_i32_0 : i32, i32
  }
  func.func @transform_18(%arg0: i32, %arg1: i32) -> (i32, i32) {
    %c0_i32 = arith.constant 0 : i32
    %c0_i32_0 = arith.constant 0 : i32
    %c0_i32_1 = arith.constant 0 : i32
    return %c0_i32, %c0_i32_0 : i32, i32
  }
  func.func @transform_19(%arg0: i32, %arg1: i32) -> (i32, i32) {
    %c0_i32 = arith.constant 0 : i32
    %c0_i32_0 = arith.constant 0 : i32
    %c0_i32_1 = arith.constant 0 : i32
    return %c0_i32, %c0_i32_0 : i32, i32
  }
  func.func @transform_20(%arg0: i32, %arg1: i32) -> (i32, i32) {
    %c0_i32 = arith.constant 0 : i32
    %c0_i32_0 = arith.constant 0 : i32
    %c0_i32_1 = arith.constant 0 : i32
    return %c0_i32, %c0_i32_0 : i32, i32
  }
  func.func @transform_21(%arg0: i32, %arg1: i32) -> (i32, i32) {
    %c0_i32 = arith.constant 0 : i32
    %c0_i32_0 = arith.constant 0 : i32
    %c0_i32_1 = arith.constant 0 : i32
    return %c0_i32, %c0_i32_0 : i32, i32
  }
  func.func @transform_22(%arg0: i32, %arg1: i32) -> (i32, i32) {
    %c0_i32 = arith.constant 0 : i32
    %c0_i32_0 = arith.constant 0 : i32
    %c0_i32_1 = arith.constant 0 : i32
    return %c0_i32, %c0_i32_0 : i32, i32
  }
  func.func @transform_23(%arg0: i32, %arg1: i32) -> (i32, i32) {
    %c0_i32 = arith.constant 0 : i32
    %c0_i32_0 = arith.constant 0 : i32
    %c0_i32_1 = arith.constant 0 : i32
    return %c0_i32, %c0_i32_0 : i32, i32
  }
  func.func @transform_24(%arg0: i32, %arg1: i32) -> (i32, i32) {
    %c0_i32 = arith.constant 0 : i32
    %c0_i32_0 = arith.constant 0 : i32
    %c0_i32_1 = arith.constant 0 : i32
    return %c0_i32, %c0_i32_0 : i32, i32
  }
  func.func @transform_25(%arg0: i32, %arg1: i32) -> (i32, i32) {
    %c0_i32 = arith.constant 0 : i32
    %c0_i32_0 = arith.constant 0 : i32
    %c0_i32_1 = arith.constant 0 : i32
    return %c0_i32, %c0_i32_0 : i32, i32
  }
  func.func @transform_26(%arg0: i32, %arg1: i32) -> (i32, i32) {
    %c0_i32 = arith.constant 0 : i32
    %c0_i32_0 = arith.constant 0 : i32
    return %arg0, %c0_i32 : i32, i32
  }
  func.func @transform_27(%arg0: i32, %arg1: i32) -> (i32, i32, i32) {
    %c0_i32 = arith.constant 0 : i32
    %c0_i32_0 = arith.constant 0 : i32
    return %arg1, %arg0, %c0_i32 : i32, i32, i32
  }
}

</mosaic_0001>

<bundles_post_ra>
// kernel: egt_forward.1
= control target key start
LH: loop header
LB: loop body
LE: loop exit
PB: predicated region body
PF: predicated region fallthrough
CT: control target
= control target key end

     0   :  { %s3970_s0 = inlined_call_operand.vmem [shape: f32[16,48], index: 0, kind: input, shape index: {}]   ;;  %s3971_s1 = inlined_call_operand.vmem [shape: f32[16,96], index: 1, kind: input, shape index: {}]   ;;  %s3972_s2 = inlined_call_operand.vmem [shape: f32[16,48], index: 2, kind: input, shape index: {}]   ;;  %s3973_s3 = inlined_call_operand.vmem [shape: f32[16,16,16], index: 3, kind: input, shape index: {}, may-alias: {3,27}]   ;;  %s3974_s4 = inlined_call_operand.vmem [shape: bf16[48,16], index: 4, kind: input, shape index: {}]   ;;  %s3975_s5 = inlined_call_operand.vmem [shape: f32[16,48], index: 5, kind: input, shape index: {}]   ;;  %s3976_s6 = inlined_call_operand.vmem [shape: f32[1,16], index: 6, kind: input, shape index: {}]   ;;  %s3977_s7 = inlined_call_operand.vmem [shape: f32[1,16], index: 7, kind: input, shape index: {}]   ;;  %s3978_s8 = inlined_call_operand.vmem [shape: bf16[16,32], index: 8, kind: input, shape index: {}]   ;;  %s3979_s9 = inlined_call_operand.vmem [shape: f32[1,32], index: 9, kind: input, shape index: {}]   ;;  %s3980_s10 = inlined_call_operand.vmem [shape: bf16[48,48], index: 10, kind: input, shape index: {}]   ;;  %s3981_s11 = inlined_call_operand.vmem [shape: bf16[16,48], index: 11, kind: input, shape index: {}]   ;;  %s3982_s12 = inlined_call_operand.vmem [shape: f32[1,48], index: 12, kind: input, shape index: {}]   ;;  %s3983_s13 = inlined_call_operand.<no memory space> [shape: f32[1,1], index: 13, kind: input, shape index: {}]   ;;  %s3984_s14 = inlined_call_operand.vmem [shape: f32[1,48], index: 14, kind: input, shape index: {}]   ;;  %s3985_s15 = inlined_call_operand.vmem [shape: f32[1,48], index: 15, kind: input, shape index: {}]   ;;  %s3986_s16 = inlined_call_operand.vmem [shape: bf16[48,96], index: 16, kind: input, shape index: {}]   ;;  %s3987_s17 = inlined_call_operand.vmem [shape: f32[1,96], index: 17, kind: input, shape index: {}]   ;;  %s3988_s18 = inlined_call_operand.vmem [shape: bf16[96,48], index: 18, kind: input, shape index: {}]   ;;  %s3989_s19 = inlined_call_operand.vmem [shape: f32[1,48], index: 19, kind: input, shape index: {}]   ;;  %s3990_s20 = inlined_call_operand.vmem [shape: f32[1,16], index: 20, kind: input, shape index: {}]   ;;  %s3991_s21 = inlined_call_operand.vmem [shape: f32[1,16], index: 21, kind: input, shape index: {}]   ;;  %s3992_s22 = inlined_call_operand.vmem [shape: bf16[16,32], index: 22, kind: input, shape index: {}]   ;;  %s3993_s23 = inlined_call_operand.vmem [shape: f32[1,32], index: 23, kind: input, shape index: {}]   ;;  %s3994_s24 = inlined_call_operand.vmem [shape: bf16[32,16], index: 24, kind: input, shape index: {}]   ;;  %s3995_s25 = inlined_call_operand.vmem [shape: f32[1,16], index: 25, kind: input, shape index: {}]   ;;  %s3996_s26 = inlined_call_operand.hbm [shape: f32[16,48], index: 26, kind: output, shape index: {0}]   ;;  %s3997_s27 = inlined_call_operand.vmem [shape: f32[16,16,16], index: 27, kind: output, shape index: {1}, may-alias: {3,27}]  }
   0x1   :  { %4018 = sst [smem:[#allocation25_spill]] %s3970_s0 }
   0x2   :  { %4019 = sst [smem:[#allocation26_spill]] %s3971_s1 }
   0x3   :  { %4020 = sst [smem:[#allocation27_spill]] %s3972_s2 }
   0x4   :  { %4021 = sst [smem:[#allocation28_spill]] %s3973_s3 }
   0x5   :  { %4022 = sst [smem:[#allocation29_spill]] %s3974_s4 }
   0x6   :  { %4023 = sst [smem:[#allocation30_spill]] %s3975_s5 }
   0x7   :  { %4024 = sst [smem:[#allocation31_spill]] %s3976_s6 }
   0x8   :  { %4025 = sst [smem:[#allocation32_spill]] %s3977_s7 }
   0x9   :  { %4026 = sst [smem:[#allocation33_spill]] %s3978_s8 }
   0xa   :  { %4027 = sst [smem:[#allocation34_spill]] %s3979_s9 }
   0xb   :  { %4028 = sst [smem:[#allocation35_spill]] %s3980_s10 }
   0xc   :  { %4029 = sst [smem:[#allocation36_spill]] %s3981_s11 }
   0xd   :  { %4030 = sst [smem:[#allocation37_spill]] %s3982_s12 }
   0xe   :  { %4031 = sst [smem:[#allocation38_spill]] %s3990_s20 }
   0xf   :  { %4032 = sst [smem:[#allocation39_spill]] %s3991_s21 }
  0x10   :  { %4033 = sst [smem:[#allocation40_spill]] %s3993_s23 }
  0x11   :  { %4034 = sst [smem:[#allocation41_spill]] %s3994_s24 }
  0x12   :  { %4035 = sst [smem:[#allocation42_spill]] %s3995_s25 }
  0x13   :  { %4036 = sst [smem:[#allocation43_spill]] %s3996_s26 }
  0x14   :  { %4037 = sst [smem:[#allocation44_spill]] %s3997_s27 }
  0x15   :  { %33 = sst [smem:[#allocation6]] %s3983_s13 }
  0x16   :  { %34 = vsyncpa [#allocation9], 0 }
  0x17   :  { %36 = vsyncpa [#allocation9 + $0x1], 0  ;;  %s3080_s8 = smov 0   ;;  %s3082_s30 = smov 0  }
  0x18   :  { %s3084_s9 = smov 0   ;;  %s3086_s5 = smov 0  }
  0x19   :  { %s3088_s28 = smov 0   ;;  %s3090_s0 = smov 0  }
  0x1a   :  { %s3092_s10 = smov 0   ;;  %s3094_s29 = smov 0  }
  0x1b   :  { %s3096_s1 = smov 0   ;;  %s3098_s13 = smov 0  }
  0x1c LB: > { %4038 = sst [smem:[#allocation12_spill]] %s2893_s8  ;;  %s2497_s6 = sadd.s32 4294967295, %s2929_s13   ;;  %s2929_s13 = sphi %s3098_s13, %s42_s13   ;;  %s2925_s1 = sphi %s3096_s1, %s4097_s1   ;;  %s2921_s29 = sphi %s3094_s29, %s4096_s29   ;;  %s2917_s10 = sphi %s3092_s10, %s4095_s10   ;;  %s2913_s0 = sphi %s3090_s0, %s4094_s0   ;;  %s2909_s28 = sphi %s3088_s28, %s4093_s28   ;;  %s2905_s5 = sphi %s3086_s5, %s4092_s5   ;;  %s2901_s9 = sphi %s3084_s9, %s4091_s9   ;;  %s2897_s30 = sphi %s3082_s30, %s4099_s30   ;;  %s2893_s8 = sphi %s3080_s8, %s4098_s8  }
  0x1d   : > { %4039 = sst [smem:[#allocation13_spill]] %s2901_s9  ;;  %s2498_s11 = sadd.s32 4294967294, %s2929_s13  }
  0x1e   : > { %4040 = sst [smem:[#allocation14_spill]] %s2909_s28  ;;  %s51_s2 = sadd.s32 1, %s2921_s29 }
  0x1f   : > { %4041 = sst [smem:[#allocation15_spill]] %s2921_s29  ;;  %s54_s3 = sadd.s32 1, %s2925_s1 }
  0x20   : > { %4042 = sst [smem:[#allocation16_spill]] %s2925_s1  ;;  %p52_p0 = scmp.ge.s32.totalorder %s51_s2, 2 }
  0x21   : > { %4043 = sst [smem:[#allocation17_spill]] %s2929_s13  ;;  %s141_s7 = sadd.s32 1, %s2909_s28 }
  0x22   : > { %p148_p1 = scmp.ne.s32.totalorder %s2909_s28, %s2905_s5  ;;  %p149_p2 = scmp.eq.s32.totalorder %s2929_s13, 0 }
  0x23   : > { %s4101_s2 = smov (%p52_p0, %s51_s2), 0  ;;  %s4103_s3 = smov (!%p52_p0, %s54_s3), %s2925_s1 }
  0x24   : > { %4044 = sst [smem:[#allocation18_spill]] %s4101_s2  ;;  %s136_s4 = ssub.s32 %s2921_s29, %s4101_s2 }
  0x25   : > { %p3146_p3 = por %p149_p2, %p148_p1  ;;  %p56_p4 = scmp.ge.s32.totalorder %s4103_s3, 2 }
  0x26   : > { %s629_s25 = sadd.s32 1, %s2901_s9  ;;  %p639_p5 = scmp.ne.s32.totalorder %s2901_s9, %s2897_s30 }
  0x27   : > { %p640_p6 = scmp.eq.s32.totalorder %s2497_s6, 3  ;;  %s4105_s3 = smov (%p56_p4, %s4103_s3), 0 }
  0x28   : > { %4046 = sst [smem:[#allocation19_spill]] %s4105_s3  ;;  %p645_p8 = scmp.ne.s32.totalorder %s2897_s30, %s2893_s8 }
  0x29   : > { %p3155_p7 = por %p640_p6, %p639_p5  ;;  %s137_s2 = ssub.s32 %s2925_s1, %s4105_s3 }
  0x2a   : > { %p646_p9 = scmp.eq.s32.totalorder %s2498_s11, 3  ;;  %s138_s23 = sor.u32 %s137_s2, %s136_s4 }
  0x2b   : > { %s4047_s26 = scalar_select %p3155_p7, 1, 0 }
  0x2c   : > { %p627_p10 = scmp.eq.s32.totalorder %s137_s2, 0  ;;  %p139_p11 = scmp.eq.s32.totalorder %s138_s23, 0 }
  0x2d   : > { %4048 = sst [smem:[#allocation20_spill]] %s4047_s26  ;;  %p3163_p12 = por %p646_p9, %p645_p8 }
  0x2e   : > { %s3168_s21 = scalar_select %p627_p10, %s2901_s9, %s629_s25  }
  0x2f   : > { %s4049_s24 = scalar_select %p3163_p12, 1, 0 }
  0x30   : > { %4051 = sst [smem:[#allocation22_spill]] %s3168_s21  ;;  %p3176_p13 = por %p640_p6, %p148_p1 }
  0x31   : > { %4050 = sst [smem:[#allocation21_spill]] %s4049_s24  ;;  %p2500_p0 = scmp.ge.s32.totalorder %s2929_s13, 4 }
  0x32   : > { %s3171_s6 = scalar_select %p139_p11, %s2909_s28, %s141_s7  }
  0x33   : > { %s4053_s20 = scalar_select %p3176_p13, 1, 0 }
  0x34   : > { %4052 = sst [smem:[#allocation23_spill]] %s3171_s6  ;;  %756 = sbr.rel (%p2500_p0) target bundleno = 75 (0x4b), region = 104 }
  0x35   : > { %4054 = sst [smem:[#allocation24_spill]] %s4053_s20 }
  0x39   : > { %780 = sbr.rel (!%p3146_p3) target bundleno = 75 (0x4b), region = 120  ;;  %s782_s23 = sand.u32 (%p3146_p3), 1, %s2909_s28  }
  0x3a   : > { %s2628_s11 = sshll.u32 (%p3146_p3), %s2921_s29, 4  ;;  %s2501_s25 = sshll.u32 (%p3146_p3), %s782_s23, 6 }
  0x3b   : > { %s787_s2 = sadd.s32 (%p3146_p3), %s2925_s1, %s2628_s11  ;;  %s4055_s6 = sld [smem:[#allocation28_spill]] (%p3146_p3) }
  0x3c   : > { %s2504_s7 = sshll.u32 (%p3146_p3), %s787_s2, 3  ;;  %s784_s9 = scalar_lea.vmem (%p3146_p3), [#allocation7], %s2501_s25 }
  0x41   : > { %s789_s21 = scalar_lea.vmem %s4055_s6, %s2504_s7 }
  0x42   : > { %v832_v0 = vld [vmem:[%s789_s21] sm:$0xff]  ;;  %v834_v1 = vld [vmem:[%s789_s21 + $0x10] sm:$0xff] }
  0x43   : > { %v836_v2 = vld [vmem:[%s789_s21 + $0x20] sm:$0xff]  ;;  %833 = vst [vmem:[%s784_s9] sm:$0xff] %v832_v0  ;;  %v838_v3 = vld [vmem:[%s789_s21 + $0x30] sm:$0xff] }
  0x44   : > { %835 = vst [vmem:[%s784_s9 + $0x8] sm:$0xff] %v834_v1  ;;  %v840_v4 = vld [vmem:[%s789_s21 + $0x40] sm:$0xff]  ;;  %v842_v5 = vld [vmem:[%s789_s21 + $0x50] sm:$0xff] }
  0x45   : > { %837 = vst [vmem:[%s784_s9 + $0x10] sm:$0xff] %v836_v2  ;;  %v844_v6 = vld [vmem:[%s789_s21 + $0x60] sm:$0xff]  ;;  %v846_v7 = vld [vmem:[%s789_s21 + $0x70] sm:$0xff] }
  0x46   : > { %839 = vst [vmem:[%s784_s9 + $0x18] sm:$0xff] %v838_v3 }
  0x47   : > { %841 = vst [vmem:[%s784_s9 + $0x20] sm:$0xff] %v840_v4 }
  0x48   : > { %843 = vst [vmem:[%s784_s9 + $0x28] sm:$0xff] %v842_v5 }
  0x49   : > { %845 = vst [vmem:[%s784_s9 + $0x30] sm:$0xff] %v844_v6 }
  0x4a   : > { %847 = vst [vmem:[%s784_s9 + $0x38] sm:$0xff] %v846_v7 }
  0x4b PF: > { %p2505_p1 = scmp.ge.s32.totalorder %s2929_s13, 1  ;;  %p852_p2 = scmp.lt.s32.totalorder %s2929_s13, 5 }
  0x4d   : > { %p853_p3 = pnand %p2505_p1, %p852_p2 }
  0x4e   : > { %s859_s27 = sand.u32 (!%p853_p3), 1, %s2905_s5   ;;  %s4010_s21 = sand.u32 (!%p853_p3), 1, %s2897_s30  }
  0x4f   : > { %856 = sbr.rel (%p853_p3) target bundleno = 2403 (0x963), region = 158  ;;  %s2506_s3 = sshll.u32 (!%p853_p3), %s859_s27, 6 }
  0x50   : > { %s3195_s9 = sshll.u32 (!%p853_p3), %s4010_s21, 3  ;;  %p946_p4 = scmp.lt.s32.totalorder (!%p853_p3), %s2917_s10, 1 }
  0x51   : > { %p950_p5 = scmp.lt.s32.totalorder (!%p853_p3), %s2913_s0, 1  ;;  %s4056_s7 = sld [smem:[#allocation25_spill]] (!%p853_p3) }
  0x52   : > { %s4057_s5 = sld [smem:[#allocation26_spill]] (!%p853_p3)  ;;  %s3216_s20 = scalar_lea.vmem (!%p853_p3), [#allocation7], %s2506_s3 }
  0x53   : > { %s4058_s8 = sld [smem:[#allocation27_spill]] (!%p853_p3)  ;;  %s939_s26 = scalar_lea.vmem (!%p853_p3), [#allocation8], %s3195_s9 }
  0x54   : > { %s947_s6 = scalar_select %p946_p4, %s2917_s10, 1 }
  0x55   : > { %s951_s23 = scalar_select %p950_p5, %s2913_s0, 1 }
  0x56   : > { %s2509_s11 = sshll.u32 %s947_s6, 3  ;;  %s3219_s6 = scalar_lea.vmem [#allocation10], %s2506_s3 }
  0x57   : > { %s3204_s4 = scalar_lea.vmem %s4056_s7, %s2509_s11  ;;  %s2510_s1 = sshll.u32 %s951_s23, 3 }
  0x58   : > { %s3209_s24 = scalar_lea.vmem %s4057_s5, %s2510_s1  ;;  %p2512_p6 = scmp.ne.s32.totalorder %s2913_s0, 0 }
  0x59   : > { %s3214_s13 = scalar_lea.vmem %s4058_s8, %s2509_s11 }
  0x5a   : > { %964 = sbr.rel (%p2512_p6) target bundleno = 100 (0x64), region = 166 }
  0x5f   : > { %vm965_vm0 = vcmask 130048   ;;  %v2931_v8 = vmov -inf   ;;  %vm968_vm1 = vcmask 392192   ;;  %v2932_v9 = vmov 0.0  }
  0x60   : > { %966 = vst.msk [vmem:[#allocation2] sm:$0xff] %vm965_vm0, %v2931_v8 }
  0x61   : > { %967 = vst.msk [vmem:[#allocation3] sm:$0xff] %vm965_vm0, %v2932_v9 }
  0x62   : > { %970 = vst.msk [vmem:[#allocation5] sm:$0xff] %vm965_vm0, %v2932_v9 }
  0x63   : > { %969 = vst.msk [vmem:[#allocation4] sm:$0xff] %vm968_vm1, %v2932_v9 }
  0x64 PF: > { %v3223_v10 = vld [vmem:[%s3216_s20 + $0x20] sm:$0xff]  ;;  %vm981_vm2 = vcmask 130048   ;;  %v3226_v11 = vld [vmem:[%s3216_s20 + $0x10] sm:$0xff]  ;;  %v3238_v16 = vld [vmem:[%s3216_s20 + $0x28] sm:$0xff]  ;;  %v2933_v24 = vmov 16.0   ;;  %s4059_s28 = sld [smem:[#allocation33_spill]] }
  0x65   : > { %v3229_v12 = vld [vmem:[%s3216_s20] sm:$0xff]  ;;  %v994_v13 = vsel %vm981_vm2, %v3223_v10, 0.0  ;;  %v988_v14 = vsel %vm981_vm2, %v3226_v11, 0.0  ;;  %v3241_v17 = vld [vmem:[%s3216_s20 + $0x18] sm:$0xff]  ;;  %v3244_v18 = vld [vmem:[%s3216_s20 + $0x8] sm:$0xff]  ;;  %v997_v19 = vsel %vm981_vm2, %v3238_v16, 0.0  ;;  %2752 = vrcp.f32 %v2933_v24 }
  0x66   : > { %v982_v15 = vsel %vm981_vm2, %v3229_v12, 0.0  ;;  %995 = vadd.xlane.f32.xlu2 %v994_v13  ;;  %989 = vadd.xlane.f32.xlu1 %v988_v14  ;;  %v991_v20 = vsel %vm981_vm2, %v3241_v17, 0.0  ;;  %v985_v21 = vsel %vm981_vm2, %v3244_v18, 0.0  ;;  %v3253_v22 = vld [vmem:[%s3216_s20 + $0x30] sm:$0xff]  ;;  %v3274_v46 = vld [vmem:[%s3216_s20 + $0x38] sm:$0xff]  ;;  %s4060_s21 = sld [smem:[#allocation31_spill]] }
  0x67   : > { %983 = vadd.xlane.f32.xlu0 %v982_v15  ;;  %v1000_v23 = vsel %vm981_vm2, %v3253_v22, 0.0  ;;  %v1003_v51 = vsel %vm981_vm2, %v3274_v46, 0.0  ;;  %s4061_s11 = sld [smem:[#allocation32_spill]]  ;;  %s2934_s29 = smov 112  }
  0x68   : > { %s4064_s7 = sld [smem:[#allocation29_spill]]  ;;  %s2935_s1 = smov 80  }
  0x69   : > { %s4066_s23 = sld [smem:[#allocation30_spill]]  ;;  %p2542_p8 = scmp.ne.s32.totalorder %s2913_s0, 1 }
  0x6a   : > { %v2629_v7 = vld [vmem:[%s4059_s28] sm:$0xff]  ;;  %s4065_s28 = sld [smem:[#allocation34_spill]] }
  0x6b   : > { %v2753_v25 = vpop.eup %2752  ;;  %1222 = vmatpush.bf16.msra.mxu0 %v2629_v7  ;;  %s4067_s27 = sld [smem:[#allocation35_spill]] (!%p2542_p8) }
  0x6c   : > { %v1007_v26 = vmul.f32 16.0, %v2753_v25  ;;  %vm1011_vm3 = vweird.f32 %v2753_v25  ;;  %s4069_s12 = sld [smem:[#allocation37_spill]] (!%p2542_p8) }
  0x6e   : > { %998 = vadd.xlane.f32.xlu2 %v997_v19  ;;  %992 = vadd.xlane.f32.xlu1 %v991_v20  ;;  %v1008_v27 = vsub.f32 1.0, %v1007_v26 }
  0x6f   : > { %986 = vadd.xlane.f32.xlu0 %v985_v21 }
  0x70   : > { %v1009_v28 = vmul.f32 %v2753_v25, %v1008_v27 }
  0x72   : > { %v1010_v29 = vadd.f32 %v2753_v25, %v1009_v28 }
  0x74   : > { %v3257_v30 = vsel %vm1011_vm3, %v2753_v25, %v1010_v29 }
  0x76   : > { %1001 = vadd.xlane.f32.xlu2 %v1000_v23 }
  0xd9   : > { %v996_v31 = vpop.xlane.xlu2 %995  ;;  %v990_v32 = vpop.xlane.xlu1 %989 }
  0xda   : > { %v984_v33 = vpop.xlane.xlu0 %983  ;;  %v1017_v42 = vmul.f32 %v3257_v30, %v996_v31  ;;  %v1015_v43 = vmul.f32 %v3257_v30, %v990_v32 }
  0xdb   : > { %v1013_v34 = vmul.f32 %v3257_v30, %v984_v33 }
  0xdc   : > { %v3282_v49 = vsub.f32 %v3223_v10, %v1017_v42  ;;  %v3285_v50 = vsub.f32 %v3226_v11, %v1015_v43 }
  0xdd   : > { %v3261_v35 = vsub.f32 %v3229_v12, %v1013_v34 }
  0xde   : > { %v1033_v58 = vmul.f32 %v3282_v49, %v3282_v49  ;;  %v1031_v59 = vmul.f32 %v3285_v50, %v3285_v50 }
  0xdf   : > { %v1029_v36 = vmul.f32 %v3261_v35, %v3261_v35 }
  0xe0   : > { %v1049_v63 = vsel %vm981_vm2, %v1033_v58, 0.0  ;;  %v1043_v0 = vsel %vm981_vm2, %v1031_v59, 0.0 }
  0xe1   : > { %v999_v37 = vpop.xlane.xlu2 %998  ;;  %v993_v38 = vpop.xlane.xlu1 %992  ;;  %v1037_v39 = vsel %vm981_vm2, %v1029_v36, 0.0 }
  0xe2   : > { %v1016_v40 = vmul.f32 %v3257_v30, %v993_v38  ;;  %1038 = vadd.xlane.f32.xlu0 %v1037_v39  ;;  %v987_v41 = vpop.xlane.xlu0 %986  ;;  %v1018_v57 = vmul.f32 %v3257_v30, %v999_v37 }
  0xe3   : > { %v1014_v44 = vmul.f32 %v3257_v30, %v987_v41 }
  0xe4   : > { %v3271_v45 = vsub.f32 %v3241_v17, %v1016_v40  ;;  %v3305_v62 = vsub.f32 %v3238_v16, %v1018_v57 }
  0xe5   : > { %v3277_v47 = vsub.f32 %v3244_v18, %v1014_v44 }
  0xe6   : > { %v1032_v48 = vmul.f32 %v3271_v45, %v3271_v45  ;;  %v1034_v2 = vmul.f32 %v3305_v62, %v3305_v62 }
  0xe7   : > { %v1030_v52 = vmul.f32 %v3277_v47, %v3277_v47 }
  0xe8   : > { %v1046_v53 = vsel %vm981_vm2, %v1032_v48, 0.0  ;;  %v1052_v3 = vsel %vm981_vm2, %v1034_v2, 0.0 }
  0xe9   : > { %v1002_v54 = vpop.xlane.xlu2 %1001  ;;  %1047 = vadd.xlane.f32.xlu2 %v1046_v53  ;;  %v1040_v55 = vsel %vm981_vm2, %v1030_v52, 0.0 }
  0xea   : > { %v1019_v56 = vmul.f32 %v3257_v30, %v1002_v54  ;;  %1004 = vadd.xlane.f32.xlu0 %v1003_v51  ;;  %1041 = vadd.xlane.f32.xlu1 %v1040_v55 }
  0xec   : > { %v3300_v60 = vsub.f32 %v3253_v22, %v1019_v56 }
  0xee   : > { %v1035_v61 = vmul.f32 %v3300_v60, %v3300_v60 }
  0xf0   : > { %v1055_v1 = vsel %vm981_vm2, %v1035_v61, 0.0 }
  0xf1   : > { %1056 = vadd.xlane.f32.xlu2 %v1055_v1 }
  0xf2   : > { %1050 = vadd.xlane.f32.xlu0 %v1049_v63  ;;  %1044 = vadd.xlane.f32.xlu1 %v1043_v0  ;;  %v3346_v63 = vld [vmem:[%s4060_s21] ss:$0 sm:$0xff]  ;;  %s1746_s21 = sld [smem:[#allocation6]] (!%p2542_p8) }
  0xf8   : > { %s1747_s3 = sadd.f32 (!%p2542_p8), 1.0, %s1746_s21 }
  0xfa   : > { %1053 = vadd.xlane.f32.xlu1 %v1052_v3 }
 0x155   : > { %v1039_v4 = vpop.xlane.xlu0 %1038 }
 0x156   : > { %v1061_v5 = vmul.f32 %v1039_v4, %v3257_v30 }
 0x158   : > { %v1069_v6 = vadd.f32 1e-05, %v1061_v5 }
 0x15a   : > { %2754 = vrsqrt.f32 %v1069_v6  ;;  %vm1083_vm5 = vweird.f32 %v1069_v6 }
 0x15c   : > { %v1048_v8 = vpop.xlane.xlu2 %1047 }
 0x15d   : > { %v1064_v9 = vmul.f32 %v1048_v8, %v3257_v30  ;;  %v1042_v13 = vpop.xlane.xlu1 %1041  ;;  %v1005_v14 = vpop.xlane.xlu0 %1004 }
 0x15e   : > { %v1062_v15 = vmul.f32 %v1042_v13, %v3257_v30  ;;  %v1020_v19 = vmul.f32 %v3257_v30, %v1005_v14 }
 0x15f   : > { %v3320_v20 = vadd.f32 1e-05, %v1064_v9 }
 0x160   : > { %v2755_v21 = vpop.eup %2754  ;;  %v1070_v23 = vadd.f32 1e-05, %v1062_v15  ;;  %v3323_v24 = vsub.f32 %v3274_v46, %v1020_v19 }
 0x161   : > { %v1078_v25 = vmul.f32 %v2755_v21, %v1069_v6  ;;  %2756 = vrsqrt.f32 %v3320_v20  ;;  %vm1084_vm4 = vweird.f32 %v2755_v21  ;;  %vm1113_vm12 = vweird.f32 %v3320_v20 }
 0x162   : > { %2758 = vrsqrt.f32 %v1070_v23  ;;  %v1036_v26 = vmul.f32 %v3323_v24, %v3323_v24  ;;  %vm1085_vm6 = vmor %vm1083_vm5, %vm1084_vm4  ;;  %vm1093_vm7 = vweird.f32 %v1070_v23  ;;  %vm1330_vm5 = vcmask 392192  }
 0x163   : > { %v1079_v27 = vmul.f32 %v2755_v21, %v1078_v25 }
 0x164   : > { %v1058_v28 = vsel %vm981_vm2, %v1036_v26, 0.0 }
 0x165   : > { %v1080_v29 = vmul.f32 0.5, %v1079_v27  ;;  %v1045_v31 = vpop.xlane.xlu1 %1044  ;;  %1059 = vadd.xlane.f32.xlu0 %v1058_v28  ;;  %v1051_v33 = vpop.xlane.xlu0 %1050  ;;  %v2632_v28 = vld [vmem:[%s4064_s7 + $0x10] sm:$0xff] }
 0x166   : > { %v1063_v32 = vmul.f32 %v1045_v31, %v3257_v30  ;;  %v1065_v40 = vmul.f32 %v1051_v33, %v3257_v30  ;;  %v3383_v33 = vld [vmem:[%s3209_s24] sm:$0xff]  ;;  %1348 = vmatpush.bf16.msra.mxu1 %v2632_v28  ;;  %2650 = vmatpush.bf16.msra.mxu3 %v2632_v28 }
 0x167   : > { %v3330_v34 = vpop.eup %2756  ;;  %v1081_v36 = vsub.f32 1.5, %v1080_v29 }
 0x168   : > { %v2759_v37 = vpop.eup %2758  ;;  %v1071_v38 = vadd.f32 1e-05, %v1063_v32  ;;  %v1108_v42 = vmul.f32 %v3330_v34, %v3320_v20  ;;  %v3335_v48 = vadd.f32 1e-05, %v1065_v40  ;;  %vm1114_vm13 = vweird.f32 %v3330_v34  ;;  %v3380_v32 = vld [vmem:[%s3204_s4] sm:$0xff] }
 0x169   : > { %v1088_v39 = vmul.f32 %v2759_v37, %v1070_v23  ;;  %v1082_v41 = vmul.f32 %v2755_v21, %v1081_v36  ;;  %vm1094_vm8 = vweird.f32 %v2759_v37  ;;  %vm3367_vm15 = vmor %vm1113_vm12, %vm1114_vm13 }
 0x16a   : > { %2760 = vrsqrt.f32 %v1071_v38  ;;  %v1109_v53 = vmul.f32 %v3330_v34, %v1108_v42  ;;  %vm1095_vm9 = vmor %vm1093_vm7, %vm1094_vm8  ;;  %vm1103_vm10 = vweird.f32 %v1071_v38  ;;  %vm1123_vm3 = vweird.f32 %v3335_v48 }
 0x16b   : > { %v1089_v43 = vmul.f32 %v2759_v37, %v1088_v39  ;;  %v1086_v52 = vsel %vm1085_vm6, %v2755_v21, %v1082_v41  ;;  %2762 = vrsqrt.f32 %v3335_v48  ;;  %v1254_v39 = vperm.slane %v3383_v33, 0 }
 0x16c   : > { %v1157_v58 = vmul.f32 %v1086_v52, %v3261_v35  ;;  %v1110_v0 = vmul.f32 0.5, %v1109_v53  ;;  %v3354_v35 = vld [vmem:[%s4061_s11] ss:$0 sm:$0xff] }
 0x16d   : > { %v1090_v44 = vmul.f32 0.5, %v1089_v43  ;;  %v1054_v51 = vpop.xlane.xlu1 %1053  ;;  %v1270_v42 = vmul.f32 %v1254_v39, %v3380_v32 }
 0x16e   : > { %v1066_v54 = vmul.f32 %v1054_v51, %v3257_v30  ;;  %v1168_v5 = vmul.f32 %v3346_v63, %v1157_v58  ;;  %v1111_v6 = vsub.f32 1.5, %v1110_v0 }
 0x16f   : > { %v1091_v55 = vsub.f32 1.5, %v1090_v44  ;;  %v2630_v44 = vld [vmem:[%s4064_s7] sm:$0xff]  ;;  %v1278_v52 = vpack.c.bf16 %v1270_v42, %v1270_v42 }
 0x170   : > { %v2761_v56 = vpop.eup %2760  ;;  %v3339_v57 = vadd.f32 1e-05, %v1066_v54  ;;  %v1179_v15 = vadd.f32 %v3354_v35, %v1168_v5  ;;  %v1112_v19 = vmul.f32 %v3330_v34, %v1111_v6 }
 0x171   : > { %v1092_v59 = vmul.f32 %v2759_v37, %v1091_v55  ;;  %v1098_v61 = vmul.f32 %v2761_v56, %v1071_v38  ;;  %vm1104_vm11 = vweird.f32 %v2761_v56  ;;  %v3357_v8 = vpop.eup %2762  ;;  %v1247_v38 = vrot.slane %v3383_v33, 1 }
 0x172   : > { %2764 = vrsqrt.f32 %v3339_v57  ;;  %vm1105_vm14 = vmor %vm1103_vm10, %vm1104_vm11  ;;  %v1118_v21 = vmul.f32 %v3357_v8, %v3335_v48  ;;  %v1116_v29 = vsel %vm3367_vm15, %v3330_v34, %v1112_v19  ;;  %v1300_v55 = vunpack.c.l.b16 %v1278_v52 }
 0x173   : > { %v1096_v1 = vsel %vm1095_vm9, %v2759_v37, %v1092_v59  ;;  %v1099_v2 = vmul.f32 %v2761_v56, %v1098_v61  ;;  %v2631_v37 = vld [vmem:[%s4064_s7 + $0x8] sm:$0xff]  ;;  %v1160_v34 = vmul.f32 %v1116_v29, %v3271_v45  ;;  %v3392_v41 = vperm.slane %v1247_v38, 0 }
 0x174   : > { %v1158_v3 = vmul.f32 %v1096_v1, %v3277_v47  ;;  %v1119_v31 = vmul.f32 %v3357_v8, %v1118_v21  ;;  %1349 = vmatpush.bf16.msra.mxu1 %v2631_v37  ;;  %2651 = vmatpush.bf16.msra.mxu3 %v2631_v37  ;;  %vm1133_vm0 = vweird.f32 %v3339_v57  ;;  %vm1124_vm4 = vweird.f32 %v3357_v8 }
 0x175   : > { %v1100_v4 = vmul.f32 0.5, %v1099_v2  ;;  %v1271_v51 = vmul.f32 %v3392_v41, %v3380_v32  ;;  %v1171_v53 = vmul.f32 %v3346_v63, %v1160_v34  ;;  %vm1125_vm7 = vmor %vm1123_vm3, %vm1124_vm4  ;;  %v1250_v52 = vrot.slane %v3383_v33, 4 }
 0x176   : > { %v1169_v7 = vmul.f32 %v3346_v63, %v1158_v3 }
 0x177   : > { %v1101_v9 = vsub.f32 1.5, %v1100_v4  ;;  %v1279_v54 = vpack.c.bf16 %v1271_v51, %v1271_v51  ;;  %v1182_v0 = vadd.f32 %v3354_v35, %v1171_v53 }
 0x178   : > { %v1180_v47 = vadd.f32 %v3354_v35, %v1169_v7  ;;  %v2765_v13 = vpop.eup %2764  ;;  %1350 = vmatpush.bf16.msra.mxu1 %v2630_v44  ;;  %2652 = vmatpush.bf16.msra.mxu3 %v2630_v44 }
 0x179   : > { %v1102_v14 = vmul.f32 %v2761_v56, %v1101_v9  ;;  %v1128_v23 = vmul.f32 %v2765_v13, %v3339_v57  ;;  %vm1134_vm1 = vweird.f32 %v2765_v13  ;;  %v1301_v59 = vunpack.c.l.b16 %v1279_v54 }
 0x17a   : > { %v1187_v25 = vpack.c.bf16 %v1180_v47, %v1179_v15  ;;  %vm1135_vm6 = vmor %vm1133_vm0, %vm1134_vm1  ;;  %v1249_v15 = vrot.slane %v3383_v33, 3  ;;  %v3435_v54 = vperm.slane %v1250_v52, 0 }
 0x17b   : > { %v1106_v26 = vsel %vm1105_vm14, %v2761_v56, %v1102_v14  ;;  %v1129_v27 = vmul.f32 %v2765_v13, %v1128_v23  ;;  %v1308_v1 = vpack.c.b16 %v1301_v59, %v1300_v55 }
 0x17c   : > { %2517 = vmatmul.msk.bf16.vlgmr.msra.gmra.mxu0 %vm981_vm2, %v1187_v25  ;;  %v1159_v36 = vmul.f32 %v1106_v26, %v3285_v50  ;;  %v1120_v50 = vmul.f32 0.5, %v1119_v31  ;;  %v1274_v59 = vmul.f32 %v3435_v54, %v3380_v32 }
 0x17d   : > { %v1130_v40 = vmul.f32 0.5, %v1129_v27  ;;  %2533 = vmatmul.msk.bf16.vlgmr.msra.gmra.mxu1 %vm1330_vm5, %v1308_v1 }
 0x17e   : > { %v1170_v43 = vmul.f32 %v3346_v63, %v1159_v36  ;;  %v1121_v56 = vsub.f32 1.5, %v1120_v50  ;;  %v1282_v1 = vpack.c.bf16 %v1274_v59, %v1274_v59 }
 0x17f   : > { %v1131_v45 = vsub.f32 1.5, %v1130_v40 }
 0x180   : > { %v1181_v58 = vadd.f32 %v3354_v35, %v1170_v43  ;;  %v1122_v2 = vmul.f32 %v3357_v8, %v1121_v56 }
 0x181   : > { %v1132_v61 = vmul.f32 %v2765_v13, %v1131_v45  ;;  %v1251_v45 = vrot.slane %v3383_v33, 5 }
 0x182   : > { %v1188_v57 = vpack.c.bf16 %v1182_v0, %v1181_v58  ;;  %v1126_v4 = vsel %vm1125_vm7, %v3357_v8, %v1122_v2 }
 0x183   : > { %v1136_v3 = vsel %vm1135_vm6, %v2765_v13, %v1132_v61  ;;  %v1161_v5 = vmul.f32 %v1126_v4, %v3282_v49  ;;  %v1248_v13 = vrot.slane %v3383_v33, 2  ;;  %v1057_v49 = vpop.xlane.xlu2 %1056  ;;  %v3437_v55 = vperm.slane %v1251_v45, 0 }
 0x184   : > { %v1162_v48 = vmul.f32 %v1136_v3, %v3305_v62  ;;  %v3424_v62 = vperm.slane %v1249_v15, 0  ;;  %v1067_v25 = vmul.f32 %v1057_v49, %v3257_v30  ;;  %v1304_v4 = vunpack.c.l.b16 %v1282_v1  ;;  %v2751_v15 = vld [vmem:[%s4065_s28] ss:$0 sm:$0xff]  ;;  %s4068_s28 = sld [smem:[#allocation36_spill]] (!%p2542_p8) }
 0x185   : > { %v1172_v7 = vmul.f32 %v3346_v63, %v1161_v5  ;;  %v3422_v8 = vperm.slane %v1248_v13, 0  ;;  %v1275_v61 = vmul.f32 %v3437_v55, %v3380_v32 }
 0x186   : > { %v1173_v6 = vmul.f32 %v3346_v63, %v1162_v48  ;;  %v1273_v21 = vmul.f32 %v3424_v62, %v3380_v32  ;;  %v1075_v29 = vadd.f32 1e-05, %v1067_v25 }
 0x187   : > { %v1183_v47 = vadd.f32 %v3354_v35, %v1172_v7  ;;  %v1272_v19 = vmul.f32 %v3422_v8, %v3380_v32  ;;  %v1283_v2 = vpack.c.bf16 %v1275_v61, %v1275_v61 }
 0x188   : > { %v1184_v9 = vadd.f32 %v3354_v35, %v1173_v6  ;;  %v1281_v20 = vpack.c.bf16 %v1273_v21, %v1273_v21  ;;  %2766 = vrsqrt.f32 %v1075_v29  ;;  %vm1143_vm8 = vweird.f32 %v1075_v29 }
 0x189   : > { %v1280_v23 = vpack.c.bf16 %v1272_v19, %v1272_v19  ;;  %v1305_v48 = vunpack.c.l.b16 %v1283_v2  ;;  %v1253_v21 = vrot.slane %v3383_v33, 7 }
 0x18a   : > { %v1189_v14 = vpack.c.bf16 %v1184_v9, %v1183_v47  ;;  %v1303_v27 = vunpack.c.l.b16 %v1281_v20 }
 0x18b   : > { %v1302_v26 = vunpack.c.l.b16 %v1280_v23  ;;  %v1310_v6 = vpack.c.b16 %v1305_v48, %v1304_v4  ;;  %v3466_v20 = vperm.slane %v1253_v21, 0 }
 0x18c   : > { %2518 = vmatmul.msk.bf16.gmra.mxu0 %vm981_vm2, %v1188_v57 }
 0x18d   : > { %v1309_v28 = vpack.c.b16 %v1303_v27, %v1302_v26  ;;  %v1277_v26 = vmul.f32 %v3466_v20, %v3380_v32 }
 0x18e   : > { %v2767_v31 = vpop.eup %2766 }
 0x18f   : > { %2534 = vmatmul.msk.bf16.gmra.mxu1 %vm1330_vm5, %v1309_v28  ;;  %v1138_v36 = vmul.f32 %v2767_v31, %v1075_v29  ;;  %vm1144_vm9 = vweird.f32 %v2767_v31 }
 0x190   : > { %vm1145_vm10 = vmor %vm1143_vm8, %vm1144_vm9 }
 0x191   : > { %v1139_v37 = vmul.f32 %v2767_v31, %v1138_v36 }
 0x193   : > { %v1140_v42 = vmul.f32 0.5, %v1139_v37 }
 0x195   : > { %v1141_v50 = vsub.f32 1.5, %v1140_v42 }
 0x197   : > { %v1142_v44 = vmul.f32 %v2767_v31, %v1141_v50 }
 0x199   : > { %v1146_v56 = vsel %vm1145_vm10, %v2767_v31, %v1142_v44  ;;  %v1285_v31 = vpack.c.bf16 %v1277_v26, %v1277_v26 }
 0x19a   : > { %v1163_v57 = vmul.f32 %v1146_v56, %v3300_v60 }
 0x19b   : > { %v1307_v37 = vunpack.c.l.b16 %v1285_v31 }
 0x19c   : > { %2519 = vmatmul.msk.bf16.gmra.mxu0 %vm981_vm2, %v1189_v14  ;;  %v1174_v9 = vmul.f32 %v3346_v63, %v1163_v57 }
 0x19e   : > { %v1185_v14 = vadd.f32 %v3354_v35, %v1174_v9 }
 0x19f   : > { %2535 = vmatmul.msk.bf16.gmra.mxu1 %vm1330_vm5, %v1310_v6 }
 0x1d8   : > { %v1060_v38 = vpop.xlane.xlu0 %1059 }
 0x1d9   : > { %v1068_v40 = vmul.f32 %v1060_v38, %v3257_v30 }
 0x1db   : > { %v1076_v34 = vadd.f32 1e-05, %v1068_v40 }
 0x1dd   : > { %2768 = vrsqrt.f32 %v1076_v34  ;;  %vm1153_vm12 = vweird.f32 %v1076_v34 }
 0x1e3   : > { %v2769_v43 = vpop.eup %2768 }
 0x1e4   : > { %v1148_v51 = vmul.f32 %v2769_v43, %v1076_v34  ;;  %vm1154_vm11 = vweird.f32 %v2769_v43 }
 0x1e5   : > { %vm1155_vm13 = vmor %vm1153_vm12, %vm1154_vm11 }
 0x1e6   : > { %v1149_v53 = vmul.f32 %v2769_v43, %v1148_v51 }
 0x1e8   : > { %v1150_v58 = vmul.f32 0.5, %v1149_v53 }
 0x1ea   : > { %v1151_v0 = vsub.f32 1.5, %v1150_v58 }
 0x1ec   : > { %v1152_v3 = vmul.f32 %v2769_v43, %v1151_v0 }
 0x1ee   : > { %v1156_v5 = vsel %vm1155_vm13, %v2769_v43, %v1152_v3 }
 0x1ef   : > { %v1164_v7 = vmul.f32 %v1156_v5, %v3323_v24 }
 0x1f1   : > { %v1175_v47 = vmul.f32 %v3346_v63, %v1164_v7 }
 0x1f3   : > { %v1186_v13 = vadd.f32 %v3354_v35, %v1175_v47  ;;  %v1252_v35 = vrot.slane %v3383_v33, 6 }
 0x1f5   : > { %v1190_v60 = vpack.c.bf16 %v1186_v13, %v1185_v14  ;;  %v3464_v23 = vperm.slane %v1252_v35, 0 }
 0x1f7   : > { %2520 = vmatmul.msk.bf16.gmra.mxu0 %vm981_vm2, %v1190_v60  ;;  %v1276_v25 = vmul.f32 %v3464_v23, %v3380_v32 }
 0x1f9   : > { %v1224_v49 = vpop.f32.mrf.mxu0  ;;  %v1284_v29 = vpack.c.bf16 %v1276_v25, %v1276_v25 }
 0x1fa   : > { %v3454_v19 = vadd.f32 %v2751_v15, %v1224_v49  ;;  %v1352_v44 = vpop.f32.mrf.mxu1 }
 0x1fb   : > { %v1306_v36 = vunpack.c.l.b16 %v1284_v29  ;;  %v1372_v61 = vmul.f32 0.5, %v1352_v44 }
 0x1fc   : > { %1388 = vrot.lane.b32.xlu1 %v3454_v19, %s2934_s29 }
 0x1fd   : > { %v1311_v38 = vpack.c.b16 %v1307_v37, %v1306_v36 }
 0x1ff   : > { %2536 = vmatmul.msk.bf16.vlgmr.msra.gmra.mxu3 %vm1330_vm5, %v1311_v38 }
 0x201   : > { %v1226_v24 = vpop.f32.mrf.mxu0 }
 0x202   : > { %v3458_v63 = vadd.f32 %v2751_v15, %v1226_v24  ;;  %v1354_v51 = vpop.f32.mrf.mxu1 }
 0x203   : > { %v1373_v52 = vmul.f32 0.5, %v1354_v51 }
 0x204   : > { %1390 = vrot.lane.b32.xlu2 %v3458_v63, %s2934_s29 }
 0x209   : > { %v1229_v27 = vpop.f32.mrf.mxu0 }
 0x20a   : > { %v3472_v28 = vadd.f32 %v2751_v15, %v1229_v27 }
 0x20c   : > { %1392 = vrot.lane.b32.xlu0 %v3472_v28, %s2934_s29  ;;  %v1357_v53 = vpop.f32.mrf.mxu1 }
 0x20d   : > { %v1374_v6 = vmul.f32 0.5, %v1357_v53 }
 0x211   : > { %v1231_v40 = vpop.f32.mrf.mxu0 }
 0x212   : > { %v3477_v34 = vadd.f32 %v2751_v15, %v1231_v40 }
 0x214   : > { %1394 = vrot.lane.b32.xlu2 %v3477_v34, %s2934_s29  ;;  %v1359_v59 = vpop.f32.mrf.mxu1 }
 0x215   : > { %v1375_v0 = vmul.f32 0.5, %v1359_v59  ;;  %v1430_v59 = vld [vmem:[#allocation2] sm:$0xff] }
 0x219   : > { %v1234_v32 = vpop.f32.mrf.mxu0 }
 0x21a   : > { %v3481_v42 = vadd.f32 %v2751_v15, %v1234_v32 }
 0x21c   : > { %1396 = vrot.lane.b32.xlu1 %v3481_v42, %s2934_s29  ;;  %v1362_v14 = vpop.f32.mrf.mxu1 }
 0x21d   : > { %v1376_v13 = vmul.f32 0.5, %v1362_v14 }
 0x221   : > { %v1236_v50 = vpop.f32.mrf.mxu0 }
 0x222   : > { %v3485_v43 = vadd.f32 %v2751_v15, %v1236_v50 }
 0x224   : > { %1398 = vrot.lane.b32.xlu0 %v3485_v43, %s2934_s29  ;;  %v1364_v24 = vpop.f32.mrf.mxu1 }
 0x225   : > { %v1377_v35 = vmul.f32 0.5, %v1364_v24 }
 0x22c   : > { %1564 = vrot.lane.b32.xlu0 %v1254_v39, %s2935_s1  ;;  %v3548_v39 = vld [vmem:[%s4066_s23 + $0x8] sm:$0xff] }
 0x22d   : > { %1556 = vmatpush.msrb.mxu3 %v3548_v39 }
 0x234   : > { %1570 = vrot.lane.b32.xlu0 %v3424_v62, %s2935_s1 }
 0x23c   : > { %1576 = vrot.lane.b32.xlu0 %v3464_v23, %s2935_s1 }
 0x25e   : > { %v1391_v45 = vpop.permute.xlu2 %1390 }
 0x25f   : > { %v3489_v56 = vadd.f32 %v1391_v45, %v1373_v52 }
 0x261   : > { %v3493_v58 = vadd.f32 %v3489_v56, %v3244_v18  ;;  %v1432_v23 = vsel %vm981_vm2, %v3489_v56, -inf }
 0x26e   : > { %v1395_v1 = vpop.permute.xlu2 %1394  ;;  %v1389_v2 = vpop.permute.xlu1 %1388 }
 0x26f   : > { %v3495_v57 = vadd.f32 %v1395_v1, %v1375_v0  ;;  %v3497_v3 = vadd.f32 %v1389_v2, %v1372_v61 }
 0x271   : > { %v3501_v4 = vadd.f32 %v3495_v57, %v3241_v17  ;;  %v3505_v48 = vadd.f32 %v3497_v3, %v3229_v12  ;;  %v1434_v36 = vsel %vm981_vm2, %v3495_v57, -inf  ;;  %v1431_v38 = vsel %vm981_vm2, %v3497_v3, -inf }
 0x274   : > { %v1239_v5 = vpop.f32.mrf.mxu0 }
 0x275   : > { %v3507_v18 = vadd.f32 %v2751_v15, %v1239_v5 }
 0x277   : > { %1400 = vrot.lane.b32.xlu2 %v3507_v18, %s2934_s29 }
 0x27c   : > { %v1241_v7 = vpop.f32.mrf.mxu0 }
 0x27d   : > { %v3511_v9 = vadd.f32 %v2751_v15, %v1241_v7 }
 0x27e   : > { %v1393_v47 = vpop.permute.xlu0 %1392 }
 0x27f   : > { %1402 = vrot.lane.b32.xlu1 %v3511_v9, %s2934_s29  ;;  %v3515_v17 = vadd.f32 %v1393_v47, %v1374_v6  ;;  %1566 = vrot.lane.b32.xlu2 %v3392_v41, %s2935_s1  ;;  %v3553_v41 = vld [vmem:[%s4066_s23] sm:$0xff] }
 0x280   : > { %1557 = vmatpush.msrb.mxu3 %v3553_v41 }
 0x281   : > { %v3519_v12 = vadd.f32 %v3515_v17, %v3226_v11  ;;  %v1433_v40 = vsel %vm981_vm2, %v3515_v17, -inf }
 0x287   : > { %1568 = vrot.lane.b32.xlu1 %v3422_v8, %s2935_s1  ;;  %1572 = vrot.lane.b32.xlu2 %v3435_v54, %s2935_s1  ;;  %v1497_v8 = vpack.c.bf16 %v3548_v39, %v3553_v41 }
 0x289   : > { %1517 = vmatpush.bf16.msra.mxu2 %v1497_v8 }
 0x28e   : > { %v1397_v60 = vpop.permute.xlu1 %1396 }
 0x28f   : > { %v3521_v49 = vadd.f32 %v1397_v60, %v1376_v13  ;;  %1574 = vrot.lane.b32.xlu1 %v3437_v55, %s2935_s1  ;;  %1578 = vrot.lane.b32.xlu2 %v3466_v20, %s2935_s1 }
 0x291   : > { %v3525_v15 = vadd.f32 %v3521_v49, %v3223_v10  ;;  %v1367_v10 = vpop.f32.mrf.mxu3  ;;  %v1435_v20 = vsel %vm981_vm2, %v3521_v49, -inf }
 0x292   : > { %v1378_v11 = vmul.f32 0.5, %v1367_v10  ;;  %v1436_v44 = vmax.f32 %v1431_v38, %v1435_v20 }
 0x296   : > { %v1399_v21 = vpop.permute.xlu0 %1398 }
 0x297   : > { %v3527_v25 = vadd.f32 %v1399_v21, %v1377_v35 }
 0x299   : > { %v3531_v26 = vadd.f32 %v3527_v25, %v3238_v16  ;;  %v1437_v62 = vsel %vm981_vm2, %v3527_v25, -inf }
 0x29a   : > { %v1438_v37 = vmax.f32 %v1432_v23, %v1437_v62 }
 0x29c   : > { %v1443_v45 = vmax.f32 %v1436_v44, %v1438_v37 }
 0x2d1   : > { %v1401_v16 = vpop.permute.xlu2 %1400 }
 0x2d2   : > { %v1418_v27 = vadd.f32 %v1401_v16, %v1378_v11 }
 0x2d4   : > { %v3543_v33 = vadd.f32 %v1418_v27, %v3253_v22  ;;  %v1369_v22 = vpop.f32.mrf.mxu3  ;;  %v1439_v29 = vsel %vm981_vm2, %v1418_v27, -inf }
 0x2d5   : > { %v1379_v54 = vmul.f32 0.5, %v1369_v22  ;;  %v1440_v51 = vmax.f32 %v1433_v40, %v1439_v29 }
 0x2f1   : > { %v1403_v55 = vpop.permute.xlu1 %1402 }
 0x2f2   : > { %v1419_v31 = vadd.f32 %v1403_v55, %v1379_v54 }
 0x2f4   : > { %v3573_v32 = vadd.f32 %v1419_v31, %v3274_v46  ;;  %v1441_v50 = vsel %vm981_vm2, %v1419_v31, -inf }
 0x2f5   : > { %v1442_v52 = vmax.f32 %v1434_v36, %v1441_v50 }
 0x2f7   : > { %v1444_v53 = vmax.f32 %v1440_v51, %v1442_v52 }
 0x2f9   : > { %v1445_v61 = vmax.f32 %v1443_v45, %v1444_v53 }
 0x2fb   : > { %v1446_v0 = vmax.f32 %v1430_v59, %v1445_v61 }
 0x2fd   : > { %v1447_v1 = vsub.f32 %v1430_v59, %v1446_v0  ;;  %1640 = vst.msk [vmem:[#allocation2] sm:$0xff] %vm981_vm2, %v1446_v0  ;;  %v1450_v2 = vsub.f32 %v3497_v3, %v1446_v0  ;;  %v1451_v5 = vsub.f32 %v3489_v56, %v1446_v0  ;;  %v1452_v46 = vsub.f32 %v3515_v17, %v1446_v0 }
 0x2fe   : > { %v1453_v6 = vsub.f32 %v3495_v57, %v1446_v0  ;;  %v1454_v14 = vsub.f32 %v3521_v49, %v1446_v0  ;;  %v1455_v60 = vsub.f32 %v3527_v25, %v1446_v0  ;;  %v1456_v21 = vsub.f32 %v1418_v27, %v1446_v0 }
 0x2ff   : > { %v1448_v7 = vmul.f32 1.442695, %v1447_v1  ;;  %v1458_v47 = vmul.f32 1.442695, %v1450_v2  ;;  %v1460_v13 = vmul.f32 1.442695, %v1451_v5  ;;  %v1457_v3 = vsub.f32 %v1419_v31, %v1446_v0 }
 0x300   : > { %v1462_v24 = vmul.f32 1.442695, %v1452_v46  ;;  %v1464_v35 = vmul.f32 1.442695, %v1453_v6  ;;  %v1466_v10 = vmul.f32 1.442695, %v1454_v14 }
 0x301   : > { %2770 = vpow2.f32 %v1448_v7  ;;  %v1468_v56 = vmul.f32 1.442695, %v1455_v60  ;;  %v1470_v17 = vmul.f32 1.442695, %v1456_v21  ;;  %v1472_v11 = vmul.f32 1.442695, %v1457_v3 }
 0x302   : > { %2772 = vpow2.f32 %v1458_v47  ;;  %v1474_v7 = vld [vmem:[#allocation3] sm:$0xff] }
 0x303   : > { %2774 = vpow2.f32 %v1460_v13 }
 0x304   : > { %2776 = vpow2.f32 %v1462_v24  ;;  %v1613_v24 = vld [vmem:[#allocation5] sm:$0xff] }
 0x305   : > { %2778 = vpow2.f32 %v1464_v35 }
 0x306   : > { %2780 = vpow2.f32 %v1466_v10 }
 0x307   : > { %v2771_v57 = vpop.eup %2770  ;;  %2782 = vpow2.f32 %v1468_v56 }
 0x308   : > { %2541 = vmatmul.msk.f32.vlgmr.msrb.gmra.mxu3 %vm981_vm2, %v2771_v57  ;;  %v2773_v49 = vpop.eup %2772  ;;  %2784 = vpow2.f32 %v1470_v17  ;;  %v1475_v10 = vmul.f32 %v2771_v57, %v1474_v7  ;;  %v1614_v17 = vmul.f32 %v2771_v57, %v1613_v24 }
 0x309   : > { %v2775_v25 = vpop.eup %2774  ;;  %v1476_v16 = vsel %vm981_vm2, %v2773_v49, 0.0  ;;  %v1615_v27 = vmul.f32 %v2773_v49, %v3454_v19  ;;  %2786 = vpow2.f32 %v1472_v11 }
 0x30a   : > { %v2777_v8 = vpop.eup %2776  ;;  %v1477_v22 = vsel %vm981_vm2, %v2775_v25, 0.0  ;;  %v1493_v62 = vpack.c.bf16 %v2775_v25, %v2773_v49  ;;  %v1616_v54 = vmul.f32 %v2775_v25, %v3458_v63 }
 0x30b   : > { %v2779_v55 = vpop.eup %2778  ;;  %v1478_v23 = vadd.f32 %v1477_v22, %v1476_v16  ;;  %v1623_v20 = vsel %vm981_vm2, %v1615_v27, 0.0  ;;  %v1617_v29 = vmul.f32 %v2777_v8, %v3472_v28  ;;  %v1479_v19 = vsel %vm981_vm2, %v2777_v8, 0.0 }
 0x30c   : > { %v2781_v31 = vpop.eup %2780  ;;  %2537 = vmatmul.msk.bf16.vlgmr.msra.gmra.mxu2 %vm981_vm2, %v1493_v62  ;;  %v1624_v36 = vsel %vm981_vm2, %v1616_v54, 0.0  ;;  %v1618_v37 = vmul.f32 %v2779_v55, %v3477_v34  ;;  %v1481_v63 = vsel %vm981_vm2, %v2779_v55, 0.0 }
 0x30d   : > { %v2783_v38 = vpop.eup %2782  ;;  %v1625_v40 = vadd.f32 %v1624_v36, %v1623_v20  ;;  %v1480_v50 = vadd.f32 %v1479_v19, %v1478_v23  ;;  %v1626_v44 = vsel %vm981_vm2, %v1617_v29, 0.0  ;;  %v1619_v51 = vmul.f32 %v2781_v31, %v3481_v42  ;;  %v1565_v23 = vpop.permute.xlu0 %1564 }
 0x30e   : > { %v2785_v52 = vpop.eup %2784  ;;  %v1628_v53 = vsel %vm981_vm2, %v1618_v37, 0.0  ;;  %v1483_v59 = vsel %vm981_vm2, %v2781_v31, 0.0  ;;  %v1620_v61 = vmul.f32 %v2783_v38, %v3485_v43  ;;  %v1485_v2 = vsel %vm981_vm2, %v2783_v38, 0.0 }
 0x30f   : > { %v1482_v28 = vadd.f32 %v1481_v63, %v1480_v50  ;;  %v1627_v45 = vadd.f32 %v1626_v44, %v1625_v40  ;;  %v2787_v0 = vpop.eup %2786  ;;  %v1630_v5 = vsel %vm981_vm2, %v1619_v51, 0.0  ;;  %v1621_v46 = vmul.f32 %v2785_v52, %v3507_v18 }
 0x310   : > { %v1622_v47 = vmul.f32 %v2787_v0, %v3511_v9  ;;  %v1632_v14 = vsel %vm981_vm2, %v1620_v61, 0.0  ;;  %v1487_v13 = vsel %vm981_vm2, %v2785_v52, 0.0  ;;  %v1489_v35 = vsel %vm981_vm2, %v2787_v0, 0.0 }
 0x311   : > { %v1629_v34 = vadd.f32 %v1628_v53, %v1627_v45  ;;  %v1484_v1 = vadd.f32 %v1483_v59, %v1482_v28  ;;  %v1634_v21 = vsel %vm981_vm2, %v1621_v46, 0.0  ;;  %v1494_v9 = vpack.c.bf16 %v2779_v55, %v2777_v8  ;;  %v1567_v8 = vpop.permute.xlu2 %1566  ;;  %v1569_v55 = vpop.permute.xlu1 %1568 }
 0x312   : > { %v1636_v18 = vsel %vm981_vm2, %v1622_v47, 0.0  ;;  %v1495_v16 = vpack.c.bf16 %v2783_v38, %v2781_v31  ;;  %v1496_v27 = vpack.c.bf16 %v2787_v0, %v2785_v52 }
 0x313   : > { %v1486_v6 = vadd.f32 %v1485_v2, %v1484_v1  ;;  %v1631_v42 = vadd.f32 %v1630_v5, %v1629_v34 }
 0x315   : > { %v1633_v60 = vadd.f32 %v1632_v14, %v1631_v42  ;;  %v1488_v43 = vadd.f32 %v1487_v13, %v1486_v6  ;;  %v1571_v29 = vpop.permute.xlu0 %1570  ;;  %v1562_v13 = vld [vmem:[#allocation4] sm:$0xff] }
 0x317   : > { %v1490_v3 = vadd.f32 %v1489_v35, %v1488_v43  ;;  %v1635_v56 = vadd.f32 %v1634_v21, %v1633_v60 }
 0x319   : > { %v1491_v11 = vadd.f32 %v1490_v3, %v1475_v10  ;;  %v1637_v49 = vadd.f32 %v1636_v18, %v1635_v56  ;;  %v1573_v50 = vpop.permute.xlu2 %1572  ;;  %v1575_v63 = vpop.permute.xlu1 %1574 }
 0x31b   : > { %1492 = vst.msk [vmem:[#allocation3] sm:$0xff] %vm981_vm2, %v1491_v11  ;;  %v1638_v25 = vadd.f32 %v1637_v49, %v1614_v17 }
 0x31c   : > { %2538 = vmatmul.msk.bf16.gmra.mxu2 %vm981_vm2, %v1494_v9 }
 0x31d   : > { %1639 = vst.msk [vmem:[#allocation5] sm:$0xff] %vm981_vm2, %v1638_v25  ;;  %v1577_v53 = vpop.permute.xlu0 %1576 }
 0x321   : > { %v1579_v6 = vpop.permute.xlu2 %1578 }
 0x32c   : > { %2539 = vmatmul.msk.bf16.gmra.mxu2 %vm981_vm2, %v1495_v16 }
 0x33c   : > { %2540 = vmatmul.msk.bf16.gmra.mxu2 %vm981_vm2, %v1496_v27 }
 0x38b   : > { %v1559_v14 = vpop.f32.mrf.mxu3 }
 0x38c   : > { %v1563_v35 = vmul.f32 %v1562_v13, %v1559_v14 }
 0x38f   : > { %v1519_v22 = vpop.f32.mrf.mxu2 }
 0x390   : > { %v1588_v37 = vmul.f32 %v1565_v23, %v1519_v22 }
 0x392   : > { %v1596_v44 = vsel %vm1330_vm5, %v1588_v37, 0.0 }
 0x397   : > { %v1521_v62 = vpop.f32.mrf.mxu2 }
 0x398   : > { %v1589_v19 = vmul.f32 %v1567_v8, %v1521_v62 }
 0x39a   : > { %v1597_v31 = vsel %vm1330_vm5, %v1589_v19, 0.0 }
 0x39b   : > { %v1598_v28 = vadd.f32 %v1597_v31, %v1596_v44 }
 0x39f   : > { %v1524_v54 = vpop.f32.mrf.mxu2 }
 0x3a0   : > { %v1590_v40 = vmul.f32 %v1569_v55, %v1524_v54 }
 0x3a2   : > { %v1599_v51 = vsel %vm1330_vm5, %v1590_v40, 0.0 }
 0x3a3   : > { %v1600_v0 = vadd.f32 %v1599_v51, %v1598_v28 }
 0x3a7   : > { %v1526_v57 = vpop.f32.mrf.mxu2 }
 0x3a8   : > { %v1591_v38 = vmul.f32 %v1571_v29, %v1526_v57 }
 0x3aa   : > { %v1601_v59 = vsel %vm1330_vm5, %v1591_v38, 0.0 }
 0x3ab   : > { %v1602_v2 = vadd.f32 %v1601_v59, %v1600_v0 }
 0x3af   : > { %v1529_v20 = vpop.f32.mrf.mxu2 }
 0x3b0   : > { %v1592_v52 = vmul.f32 %v1573_v50, %v1529_v20 }
 0x3b2   : > { %v1603_v34 = vsel %vm1330_vm5, %v1592_v52, 0.0 }
 0x3b3   : > { %v1604_v46 = vadd.f32 %v1603_v34, %v1602_v2 }
 0x3b7   : > { %v1531_v36 = vpop.f32.mrf.mxu2 }
 0x3b8   : > { %v1593_v61 = vmul.f32 %v1575_v63, %v1531_v36 }
 0x3ba   : > { %v1605_v5 = vsel %vm1330_vm5, %v1593_v61, 0.0 }
 0x3bb   : > { %v1606_v7 = vadd.f32 %v1605_v5, %v1604_v46 }
 0x3bf   : > { %v1534_v45 = vpop.f32.mrf.mxu2 }
 0x3c0   : > { %v1594_v1 = vmul.f32 %v1577_v53, %v1534_v45 }
 0x3c2   : > { %v1607_v42 = vsel %vm1330_vm5, %v1594_v1, 0.0 }
 0x3c3   : > { %v1608_v43 = vadd.f32 %v1607_v42, %v1606_v7 }
 0x3c7   : > { %v1536_v47 = vpop.f32.mrf.mxu2 }
 0x3c8   : > { %v1595_v60 = vmul.f32 %v1579_v6, %v1536_v47 }
 0x3ca   : > { %v1609_v24 = vsel %vm1330_vm5, %v1595_v60, 0.0 }
 0x3cb   : > { %v1610_v21 = vadd.f32 %v1609_v24, %v1608_v43  ;;  %1644 = sbr.rel (%p2542_p8) target bundleno = 1794 (0x702), region = 170 }
 0x3cd   : > { %v1611_v10 = vadd.f32 %v1610_v21, %v1563_v35 }
 0x3cf   : > { %1612 = vst.msk [vmem:[#allocation4] sm:$0xff] %vm1330_vm5, %v1611_v10 }
 0x3d0   : > { %1664 = vmatpush.msra.mxu1 %v3548_v39  ;;  %v1645_v3 = vld [vmem:[#allocation3] sm:$0xff]  ;;  %v2635_v56 = vld [vmem:[%s4067_s27 + $0x10] sm:$0xff]  ;;  %v2636_v39 = vld [vmem:[%s4068_s28] sm:$0xff]  ;;  %v1748_v23 = vstv %s1747_s3  ;;  %v2936_v50 = vmov 48.0   ;;  %vm1885_vm3 = vcmask 785408  }
 0x3d1   : > { %2793 = vrcp.f32 %v1645_v3  ;;  %1732 = vmatpush.bf16.msra.mxu2 %v2635_v56  ;;  %v2634_v18 = vld [vmem:[%s4067_s27 + $0x8] sm:$0xff]  ;;  %v1672_v11 = vld [vmem:[#allocation5] sm:$0xff]  ;;  %v1745_v57 = vld [vmem:[%s3214_s13] sm:$0xff] }
 0x3d2   : > { %1665 = vmatpush.msra.mxu1 %v3553_v41  ;;  %v2633_v41 = vld [vmem:[%s4067_s27] sm:$0xff]  ;;  %v1749_v29 = vmul.f32 %v1748_v23, %v1745_v57  ;;  %2795 = vrcp.f32 %v2936_v50  ;;  %v2639_v0 = vld [vmem:[%s3986_s16 + $0x10] sm:$0xff]  ;;  %v2638_v34 = vld [vmem:[%s3986_s16 + $0x8] sm:$0xff] }
 0x3d3   : > { %v2788_v20 = vld [vmem:[%s4069_s12] ss:$0 sm:$0xff]  ;;  %1827 = vmatpush.bf16.msra.mxu3 %v2639_v0  ;;  %v2645_v2 = vld [vmem:[%s3988_s18 + $0x28] sm:$0xff]  ;;  %v2643_v7 = vld [vmem:[%s3988_s18 + $0x18] sm:$0xff] }
 0x3d4   : > { %1700 = vmatpush.bf16.msrb.mxu1 %v2636_v39  ;;  %v2637_v1 = vld [vmem:[%s3986_s16] sm:$0xff]  ;;  %1891 = vmatpush.bf16.msra.mxu0 %v2645_v2  ;;  %v2642_v47 = vld [vmem:[%s3988_s18 + $0x10] sm:$0xff] }
 0x3d5   : > { %1733 = vmatpush.bf16.msra.mxu2 %v2634_v18  ;;  %v2644_v6 = vld [vmem:[%s3988_s18 + $0x20] sm:$0xff] }
 0x3d6   : > { %v1670_v25 = vld [vmem:[#allocation4] sm:$0xff]  ;;  %v2789_v21 = vld [vmem:[%s3984_s14] ss:$0 sm:$0xff] }
 0x3d7   : > { %v2794_v17 = vpop.eup %2793  ;;  %1828 = vmatpush.bf16.msra.mxu3 %v2638_v34  ;;  %v2790_v56 = vld [vmem:[%s3985_s15] ss:$0 sm:$0xff] }
 0x3d8   : > { %2543 = vmatmul.msk.f32.vlgmr.msra.gmra.mxu1 %vm981_vm2, %v2794_v17  ;;  %v1673_v49 = vmul.f32 %v2794_v17, %v1672_v11  ;;  %v2796_v31 = vpop.eup %2795  ;;  %1892 = vmatpush.bf16.msra.mxu0 %v2644_v6  ;;  %v2641_v11 = vld [vmem:[%s3988_s18 + $0x8] sm:$0xff] }
 0x3d9   : > { %1734 = vmatpush.bf16.msra.mxu2 %v2633_v41  ;;  %v1757_v38 = vmul.f32 48.0, %v2796_v31  ;;  %vm1761_vm14 = vweird.f32 %v2796_v31  ;;  %v2791_v41 = vld [vmem:[%s3987_s17] ss:$0 sm:$0xff] }
 0x3da   : > { %v1681_v9 = vpack.c.bf16 %v1673_v49, %v1673_v49  ;;  %v2640_v49 = vld [vmem:[%s3988_s18] sm:$0xff] }
 0x3db   : > { %v1758_v63 = vsub.f32 1.0, %v1757_v38  ;;  %1829 = vmatpush.bf16.msra.mxu3 %v2637_v1 }
 0x3dc   : > { %1893 = vmatpush.bf16.msra.mxu0 %v2643_v7 }
 0x3dd   : > { %v1759_v44 = vmul.f32 %v2796_v31, %v1758_v63 }
 0x3df   : > { %v1760_v51 = vadd.f32 %v2796_v31, %v1759_v44 }
 0x3e0   : > { %2548 = vmatmul.msk.bf16.vlgmr.msrb.gmra.mxu1 %vm981_vm2, %v1681_v9  ;;  %1894 = vmatpush.bf16.msra.mxu0 %v2642_v47 }
 0x3e1   : > { %v1762_v52 = vsel %vm1761_vm14, %v2796_v31, %v1760_v51 }
 0x3e4   : > { %1895 = vmatpush.bf16.msra.mxu0 %v2641_v11 }
 0x3e8   : > { %1896 = vmatpush.bf16.msra.mxu0 %v2640_v49 }
 0x455   : > { %v1667_v16 = vpop.f32.mrf.mxu1 }
 0x456   : > { %v1671_v27 = vmul.f32 %v1670_v25, %v1667_v16 }
 0x458   : > { %v1674_v22 = vpack.c.bf16 %v1671_v27, %v1671_v27 }
 0x45a   : > { %2561 = vmatmul.msk.bf16.vlgmr.msra.gmra.mxu2 %vm1330_vm5, %v1674_v22 }
 0x45d   : > { %v1702_v62 = vpop.f32.mrf.mxu1 }
 0x465   : > { %v1704_v54 = vpop.f32.mrf.mxu1 }
 0x4dd   : > { %v1736_v8 = vpop.f32.mrf.mxu2 }
 0x4de   : > { %v1737_v55 = vadd.f32 %v1736_v8, %v1702_v62  ;;  %v2792_v62 = vld [vmem:[%s3989_s19] ss:$0 sm:$0xff] }
 0x4e0   : > { %v1744_v36 = vadd.f32 %v2788_v20, %v1737_v55 }
 0x4e2   : > { %v3645_v19 = vadd.f32 %v1749_v29, %v1744_v36 }
 0x4e4   : > { %v1753_v37 = vsel %vm1330_vm5, %v3645_v19, 0.0 }
 0x4e5   : > { %v1738_v40 = vpop.f32.mrf.mxu2  ;;  %1754 = vadd.xlane.f32.xlu0 %v1753_v37 }
 0x558   : > { %v1755_v28 = vpop.xlane.xlu0 %1754 }
 0x559   : > { %v1763_v45 = vmul.f32 %v1762_v52, %v1755_v28 }
 0x55b   : > { %v1764_v53 = vsub.f32 %v3645_v19, %v1763_v45 }
 0x55d   : > { %v1765_v59 = vmul.f32 %v1764_v53, %v1764_v53 }
 0x55f   : > { %v1766_v61 = vsel %vm1330_vm5, %v1765_v59, 0.0 }
 0x560   : > { %1767 = vadd.xlane.f32.xlu0 %v1766_v61 }
 0x5d3   : > { %v1768_v5 = vpop.xlane.xlu0 %1767 }
 0x5d4   : > { %v1769_v46 = vmul.f32 %v1768_v5, %v1762_v52 }
 0x5d6   : > { %v1770_v42 = vadd.f32 1e-05, %v1769_v46 }
 0x5d8   : > { %2797 = vrsqrt.f32 %v1770_v42  ;;  %vm1777_vm0 = vweird.f32 %v1770_v42 }
 0x5de   : > { %v2798_v14 = vpop.eup %2797 }
 0x5df   : > { %v1772_v13 = vmul.f32 %v2798_v14, %v1770_v42  ;;  %vm1778_vm15 = vweird.f32 %v2798_v14 }
 0x5e0   : > { %vm1779_vm1 = vmor %vm1777_vm0, %vm1778_vm15 }
 0x5e1   : > { %v1773_v60 = vmul.f32 %v2798_v14, %v1772_v13 }
 0x5e3   : > { %v1774_v43 = vmul.f32 0.5, %v1773_v60 }
 0x5e5   : > { %v1775_v24 = vsub.f32 1.5, %v1774_v43 }
 0x5e7   : > { %v1776_v35 = vmul.f32 %v2798_v14, %v1775_v24 }
 0x5e9   : > { %v1780_v10 = vsel %vm1779_vm1, %v2798_v14, %v1776_v35 }
 0x5ea   : > { %v1781_v3 = vmul.f32 %v1780_v10, %v1764_v53 }
 0x5ec   : > { %v1785_v18 = vmul.f32 %v2789_v21, %v1781_v3 }
 0x5ee   : > { %v1789_v17 = vadd.f32 %v2790_v56, %v1785_v18 }
 0x5f0   : > { %v1790_v39 = vpack.c.bf16 %v1789_v17, %v1789_v17 }
 0x5f2   : > { %2574 = vmatmul.msk.bf16.vlgmr.msra.gmra.mxu3 %vm1330_vm5, %v1790_v39 }
 0x675   : > { %v1831_v9 = vpop.f32.mrf.mxu3 }
 0x676   : > { %v1832_v25 = vadd.f32 %v2791_v41, %v1831_v9 }
 0x678   : > { %v1835_v16 = vmax.f32 %v1832_v25, 0.0 }
 0x67a   : > { %v1836_v27 = vpack.c.bf16 %v1835_v16, %v1835_v16 }
 0x67c   : > { %2599 = vmatmul.msk.bf16.vlgmr.msra.gmra.mxu0 %vm1885_vm3, %v1836_v27 }
 0x67d   : > { %v1833_v22 = vpop.f32.mrf.mxu3 }
 0x6f9   : > { %v1898_v54 = vpop.f32.mrf.mxu0 }
 0x6fa   : > { %v1902_v57 = vadd.f32 %v1898_v54, %v3645_v19 }
 0x6fc   : > { %v1907_v23 = vadd.f32 %v2792_v62, %v1902_v57 }
 0x6fe   : > { %1908 = vst.msk [vmem:[%s939_s26] sm:$0xff] %vm1330_vm5, %v1907_v23 }
 0x701   : > { %v1900_v20 = vpop.f32.mrf.mxu0 }
 0x702 PF: > { %v1923_v8 = vsel %vm981_vm2, %v3525_v15, 0.0  ;;  %v1917_v55 = vsel %vm981_vm2, %v3519_v12, 0.0  ;;  %v1911_v29 = vsel %vm981_vm2, %v3505_v48, 0.0  ;;  %v1926_v36 = vsel %vm981_vm2, %v3531_v26, 0.0  ;;  %v2646_v23 = vld [vmem:[%s3992_s22] sm:$0xff]  ;;  %s4074_s5 = sld [smem:[#allocation38_spill]] }
 0x703   : > { %1924 = vadd.xlane.f32.xlu1 %v1923_v8  ;;  %1918 = vadd.xlane.f32.xlu0 %v1917_v55  ;;  %v1920_v19 = vsel %vm981_vm2, %v3501_v4, 0.0  ;;  %v1914_v37 = vsel %vm981_vm2, %v3493_v58, 0.0  ;;  %v1929_v40 = vsel %vm981_vm2, %v3543_v33, 0.0  ;;  %v1932_v50 = vsel %vm981_vm2, %v3573_v32, 0.0  ;;  %s4075_s20 = sld [smem:[#allocation39_spill]]  ;;  %s2281_s28 = sshll.u32 %s939_s26, 4  ;;  %s2282_s28 = int_to_ptr.vmem [resolvable:$true] %s2281_s28 }
 0x704   : > { %1912 = vadd.xlane.f32.xlu2 %v1911_v29  ;;  %2653 = vmatpush.bf16.msra.mxu3 %v2646_v23  ;;  %s4078_s29 = sld [smem:[#allocation41_spill]]  ;;  %s4083_s1 = sand.u32 1, %s2897_s30  }
 0x705   : > { %2144 = vmatpush.bf16.msra.mxu0 %v2646_v23  ;;  %s4080_s13 = sld [smem:[#allocation40_spill]]  ;;  %s2265_s3 = scalar_lea.sflag [#allocation9], %s4083_s1 }
 0x70a   : > { %s4079_s21 = smov %s4078_s29 }
 0x70b   : > { %1927 = vadd.xlane.f32.xlu1 %v1926_v36  ;;  %1921 = vadd.xlane.f32.xlu0 %v1920_v19 }
 0x70c   : > { %1915 = vadd.xlane.f32.xlu2 %v1914_v37 }
 0x713   : > { %1930 = vadd.xlane.f32.xlu0 %v1929_v40  ;;  %1933 = vadd.xlane.f32.xlu1 %v1932_v50 }
 0x776   : > { %v1925_v31 = vpop.xlane.xlu1 %1924  ;;  %v1919_v38 = vpop.xlane.xlu0 %1918 }
 0x777   : > { %v1939_v63 = vmul.f32 %v1925_v31, %v3257_v30  ;;  %v1937_v44 = vmul.f32 %v1919_v38, %v3257_v30  ;;  %v1913_v51 = vpop.xlane.xlu2 %1912 }
 0x778   : > { %v1935_v1 = vmul.f32 %v1913_v51, %v3257_v30 }
 0x779   : > { %v3714_v52 = vsub.f32 %v3525_v15, %v1939_v63  ;;  %v3717_v28 = vsub.f32 %v3519_v12, %v1937_v44 }
 0x77a   : > { %v3739_v14 = vsub.f32 %v3505_v48, %v1935_v1 }
 0x77b   : > { %v1955_v45 = vmul.f32 %v3714_v52, %v3714_v52  ;;  %v1953_v53 = vmul.f32 %v3717_v28, %v3717_v28 }
 0x77c   : > { %v1951_v17 = vmul.f32 %v3739_v14, %v3739_v14 }
 0x77d   : > { %v1971_v59 = vsel %vm981_vm2, %v1955_v45, 0.0  ;;  %v1965_v61 = vsel %vm981_vm2, %v1953_v53, 0.0 }
 0x77e   : > { %1972 = vadd.xlane.f32.xlu1 %v1971_v59  ;;  %v1928_v0 = vpop.xlane.xlu1 %1927  ;;  %v1922_v34 = vpop.xlane.xlu0 %1921  ;;  %1966 = vadd.xlane.f32.xlu2 %v1965_v61  ;;  %v1959_v41 = vsel %vm981_vm2, %v1951_v17, 0.0 }
 0x77f   : > { %v1940_v2 = vmul.f32 %v1928_v0, %v3257_v30  ;;  %v1938_v5 = vmul.f32 %v1922_v34, %v3257_v30  ;;  %v1916_v46 = vpop.xlane.xlu2 %1915 }
 0x780   : > { %v1936_v6 = vmul.f32 %v1916_v46, %v3257_v30 }
 0x781   : > { %v3730_v42 = vsub.f32 %v3531_v26, %v1940_v2  ;;  %v3733_v7 = vsub.f32 %v3501_v4, %v1938_v5 }
 0x782   : > { %v3736_v47 = vsub.f32 %v3493_v58, %v1936_v6 }
 0x783   : > { %v1954_v13 = vmul.f32 %v3733_v7, %v3733_v7  ;;  %v1956_v60 = vmul.f32 %v3730_v42, %v3730_v42 }
 0x784   : > { %v1952_v43 = vmul.f32 %v3736_v47, %v3736_v47 }
 0x785   : > { %v1968_v24 = vsel %vm981_vm2, %v1954_v13, 0.0  ;;  %v1974_v35 = vsel %vm981_vm2, %v1956_v60, 0.0 }
 0x786   : > { %1969 = vadd.xlane.f32.xlu0 %v1968_v24  ;;  %v1931_v21 = vpop.xlane.xlu0 %1930  ;;  %1975 = vadd.xlane.f32.xlu2 %v1974_v35  ;;  %v1962_v10 = vsel %vm981_vm2, %v1952_v43, 0.0  ;;  %v1934_v3 = vpop.xlane.xlu1 %1933 }
 0x787   : > { %v1941_v56 = vmul.f32 %v1931_v21, %v3257_v30  ;;  %1963 = vadd.xlane.f32.xlu1 %v1962_v10  ;;  %v1942_v18 = vmul.f32 %v1934_v3, %v3257_v30 }
 0x789   : > { %v3755_v39 = vsub.f32 %v3543_v33, %v1941_v56  ;;  %v3758_v11 = vsub.f32 %v3573_v32, %v1942_v18 }
 0x78b   : > { %v1957_v49 = vmul.f32 %v3755_v39, %v3755_v39  ;;  %v1958_v25 = vmul.f32 %v3758_v11, %v3758_v11 }
 0x78d   : > { %v1977_v9 = vsel %vm981_vm2, %v1957_v49, 0.0  ;;  %v1980_v16 = vsel %vm981_vm2, %v1958_v25, 0.0 }
 0x78e   : > { %1978 = vadd.xlane.f32.xlu2 %v1977_v9  ;;  %1960 = vadd.xlane.f32.xlu0 %v1959_v41 }
 0x796   : > { %1981 = vadd.xlane.f32.xlu0 %v1980_v16 }
 0x7f1   : > { %v1973_v27 = vpop.xlane.xlu1 %1972  ;;  %v1967_v22 = vpop.xlane.xlu2 %1966 }
 0x7f2   : > { %v1985_v62 = vmul.f32 %v1967_v22, %v3257_v30  ;;  %v1987_v57 = vmul.f32 %v1973_v27, %v3257_v30 }
 0x7f4   : > { %v1993_v54 = vadd.f32 1e-05, %v1985_v62  ;;  %v3772_v20 = vadd.f32 1e-05, %v1987_v57 }
 0x7f6   : > { %2803 = vrsqrt.f32 %v1993_v54  ;;  %vm2025_vm5 = vweird.f32 %v1993_v54  ;;  %vm2045_vm1 = vweird.f32 %v3772_v20 }
 0x7f7   : > { %2805 = vrsqrt.f32 %v3772_v20 }
 0x7f9   : > { %v1970_v8 = vpop.xlane.xlu0 %1969  ;;  %v1976_v55 = vpop.xlane.xlu2 %1975 }
 0x7fa   : > { %v1986_v29 = vmul.f32 %v1970_v8, %v3257_v30  ;;  %v1964_v36 = vpop.xlane.xlu1 %1963  ;;  %v1988_v19 = vmul.f32 %v1976_v55, %v3257_v30 }
 0x7fb   : > { %v1984_v37 = vmul.f32 %v1964_v36, %v3257_v30  ;;  %v3818_v36 = vld [vmem:[%s4074_s5] ss:$0 sm:$0xff]  ;;  %s2622_s5 = sshll.u32 %s2917_s10, 3 }
 0x7fc   : > { %v1994_v40 = vadd.f32 1e-05, %v1986_v29  ;;  %v3777_v50 = vadd.f32 1e-05, %v1988_v19  ;;  %v2804_v31 = vpop.eup %2803 }
 0x7fd   : > { %v1992_v38 = vadd.f32 1e-05, %v1984_v37  ;;  %v2020_v63 = vmul.f32 %v2804_v31, %v1993_v54  ;;  %v3782_v61 = vpop.eup %2805  ;;  %vm2026_vm4 = vweird.f32 %v2804_v31 }
 0x7fe   : > { %2807 = vrsqrt.f32 %v1994_v40  ;;  %v2040_v13 = vmul.f32 %v3782_v61, %v3772_v20  ;;  %vm3798_vm6 = vmor %vm2025_vm5, %vm2026_vm4  ;;  %vm2035_vm9 = vweird.f32 %v1994_v40  ;;  %vm2055_vm13 = vweird.f32 %v3777_v50 }
 0x7ff   : > { %2809 = vrsqrt.f32 %v1992_v38  ;;  %v2021_v44 = vmul.f32 %v2804_v31, %v2020_v63  ;;  %vm2015_vm7 = vweird.f32 %v1992_v38  ;;  %vm2046_vm3 = vweird.f32 %v3782_v61 }
 0x800   : > { %2811 = vrsqrt.f32 %v3777_v50  ;;  %v2041_v17 = vmul.f32 %v3782_v61, %v2040_v13 }
 0x801   : > { %v1961_v51 = vpop.xlane.xlu0 %1960  ;;  %v2022_v45 = vmul.f32 0.5, %v2021_v44  ;;  %v1979_v59 = vpop.xlane.xlu2 %1978 }
 0x802   : > { %v1983_v53 = vmul.f32 %v1961_v51, %v3257_v30  ;;  %v1989_v46 = vmul.f32 %v1979_v59, %v3257_v30  ;;  %v2042_v8 = vmul.f32 0.5, %v2041_v17  ;;  %v2800_v51 = vld [vmem:[%s4075_s20] ss:$0 sm:$0xff]  ;;  %s4082_s20 = sld [smem:[#allocation43_spill]] }
 0x803   : > { %v2023_v34 = vsub.f32 1.5, %v2022_v45 }
 0x804   : > { %v2808_v0 = vpop.eup %2807  ;;  %v3784_v1 = vadd.f32 1e-05, %v1983_v53  ;;  %v3795_v56 = vadd.f32 1e-05, %v1989_v46  ;;  %v2043_v44 = vsub.f32 1.5, %v2042_v8 }
 0x805   : > { %v2810_v2 = vpop.eup %2809  ;;  %v2030_v5 = vmul.f32 %v2808_v0, %v1994_v40  ;;  %v2024_v43 = vmul.f32 %v2804_v31, %v2023_v34  ;;  %vm2036_vm10 = vweird.f32 %v2808_v0 }
 0x806   : > { %v3787_v6 = vpop.eup %2811  ;;  %v2010_v60 = vmul.f32 %v2810_v2, %v1992_v38  ;;  %2813 = vrsqrt.f32 %v3784_v1  ;;  %vm2016_vm8 = vweird.f32 %v2810_v2  ;;  %vm2037_vm12 = vmor %vm2035_vm9, %vm2036_vm10  ;;  %vm2005_vm15 = vweird.f32 %v3784_v1 }
 0x807   : > { %v2031_v24 = vmul.f32 %v2808_v0, %v2030_v5  ;;  %v2050_v35 = vmul.f32 %v3787_v6, %v3777_v50  ;;  %v2028_v16 = vsel %vm3798_vm6, %v2804_v31, %v2024_v43  ;;  %2815 = vrsqrt.f32 %v3795_v56  ;;  %vm3809_vm11 = vmor %vm2015_vm7, %vm2016_vm8 }
 0x808   : > { %v2011_v21 = vmul.f32 %v2810_v2, %v2010_v60  ;;  %v2081_v29 = vmul.f32 %v2028_v16, %v3717_v28  ;;  %vm2056_vm14 = vweird.f32 %v3787_v6  ;;  %v2044_v13 = vmul.f32 %v3782_v61, %v2043_v44  ;;  %vm2047_vm6 = vmor %vm2045_vm1, %vm2046_vm3  ;;  %s2279_s8 = scalar_lea.hbm %s4082_s20, %s2622_s5  ;;  %s2839_s12 = scalar_lea.hbm %s4082_s20, 16 }
 0x809   : > { %v2032_v10 = vmul.f32 0.5, %v2031_v24  ;;  %v2051_v3 = vmul.f32 %v3787_v6, %v2050_v35  ;;  %v1982_v18 = vpop.xlane.xlu0 %1981  ;;  %vm3835_vm4 = vmor %vm2055_vm13, %vm2056_vm14  ;;  %vm2065_vm9 = vweird.f32 %v3795_v56  ;;  %vm2194_vm13 = vcmask 261120  }
 0x80a   : > { %v2012_v41 = vmul.f32 0.5, %v2011_v21  ;;  %v1990_v9 = vmul.f32 %v1982_v18, %v3257_v30  ;;  %v2092_v28 = vmul.f32 %v3818_v36, %v2081_v29  ;;  %v2048_v18 = vsel %vm2047_vm6, %v3782_v61, %v2044_v13 }
 0x80b   : > { %v2033_v25 = vsub.f32 1.5, %v2032_v10  ;;  %v2052_v57 = vmul.f32 0.5, %v2051_v3 }
 0x80c   : > { %v2814_v27 = vpop.eup %2813  ;;  %v2013_v22 = vsub.f32 1.5, %v2012_v41  ;;  %v3805_v62 = vadd.f32 1e-05, %v1990_v9 }
 0x80d   : > { %v2034_v54 = vmul.f32 %v2808_v0, %v2033_v25  ;;  %v2000_v23 = vmul.f32 %v2814_v27, %v3784_v1  ;;  %v2053_v31 = vsub.f32 1.5, %v2052_v57  ;;  %v2816_v45 = vpop.eup %2815  ;;  %vm2006_vm0 = vweird.f32 %v2814_v27 }
 0x80e   : > { %v2014_v30 = vmul.f32 %v2810_v2, %v2013_v22  ;;  %2817 = vrsqrt.f32 %v3805_v62  ;;  %vm2007_vm5 = vmor %vm2005_vm15, %vm2006_vm0  ;;  %v2103_v1 = vadd.f32 %v2800_v51, %v2092_v28  ;;  %v2060_v20 = vmul.f32 %v2816_v45, %v3795_v56 }
 0x80f   : > { %v2001_v19 = vmul.f32 %v2814_v27, %v2000_v23  ;;  %v2038_v37 = vsel %vm2037_vm12, %v2808_v0, %v2034_v54  ;;  %v2054_v50 = vmul.f32 %v3787_v6, %v2053_v31  ;;  %v2083_v25 = vmul.f32 %v2048_v18, %v3714_v52  ;;  %v2648_v31 = vld [vmem:[%s4078_s29 + $0x8] sm:$0xff]  ;;  %s2283_s29 = sshll.u32 %s2279_s8, 4  ;;  %s2284_s29 = int_to_ptr.hbm [resolvable:$true] %s2283_s29 }
 0x810   : > { %v2018_v40 = vsel %vm3809_vm11, %v2810_v2, %v2014_v30  ;;  %v2082_v63 = vmul.f32 %v2038_v37, %v3733_v7  ;;  %v2061_v3 = vmul.f32 %v2816_v45, %v2060_v20  ;;  %vm2075_vm7 = vweird.f32 %v3805_v62  ;;  %2213 = vmatpush.bf16.msra.mxu1 %v2648_v31  ;;  %2654 = vmatpush.bf16.msra.mxu2 %v2648_v31  ;;  %s2833_s11 = sshra.s32 %s2284_s29, 4  ;;  %s2834_s11 = int_to_ptr.hbm [resolvable:$true] %s2833_s11 }
 0x811   : > { %v2002_v38 = vmul.f32 0.5, %v2001_v19  ;;  %v2080_v7 = vmul.f32 %v2018_v40, %v3736_v47  ;;  %v2058_v21 = vsel %vm3835_vm4, %v3787_v6, %v2054_v50  ;;  %v2094_v22 = vmul.f32 %v3818_v36, %v2083_v25  ;;  %s2835_s25 = scalar_lea.hbm %s2834_s11, 8  ;;  %p2840_p0 = scmp.lt.s32.totalorder %s2834_s11, %s4082_s20 }
 0x812   : > { %v2093_v59 = vmul.f32 %v3818_v36, %v2082_v63  ;;  %v2084_v41 = vmul.f32 %v2058_v21, %v3730_v42  ;;  %v2062_v16 = vmul.f32 0.5, %v2061_v3  ;;  %vm2066_vm10 = vweird.f32 %v2816_v45  ;;  %p2836_p9 = scmp.ne.s32.totalorder %s2834_s11, %s2835_s25  ;;  %p2841_p1 = scmp.lt.s32.totalorder %s2839_s12, %s2835_s25 }
 0x813   : > { %v2003_v53 = vsub.f32 1.5, %v2002_v38  ;;  %v2091_v24 = vmul.f32 %v3818_v36, %v2080_v7  ;;  %v2105_v57 = vadd.f32 %v2800_v51, %v2094_v22  ;;  %vm2067_vm12 = vmor %vm2065_vm9, %vm2066_vm10 }
 0x814   : > { %v2818_v0 = vpop.eup %2817  ;;  %v2104_v46 = vadd.f32 %v2800_v51, %v2093_v59  ;;  %v2095_v6 = vmul.f32 %v3818_v36, %v2084_v41  ;;  %v2063_v54 = vsub.f32 1.5, %v2062_v16  ;;  %p2837_p10 = pnand %p2836_p9, %p3155_p7  ;;  %p2842_p2 = por %p2841_p1, %p2840_p0 }
 0x815   : > { %v2004_v2 = vmul.f32 %v2814_v27, %v2003_v53  ;;  %v2070_v5 = vmul.f32 %v2818_v0, %v3805_v62  ;;  %v2102_v49 = vadd.f32 %v2800_v51, %v2091_v24  ;;  %vm2076_vm8 = vweird.f32 %v2818_v0 }
 0x816   : > { %v2110_v47 = vpack.c.bf16 %v2104_v46, %v2103_v1  ;;  %v2106_v61 = vadd.f32 %v2800_v51, %v2095_v6  ;;  %vm2077_vm11 = vmor %vm2075_vm7, %vm2076_vm8  ;;  %v2064_v52 = vmul.f32 %v2816_v45, %v2063_v54  ;;  %p2838_p11 = pneg %p2837_p10 }
 0x817   : > { %v2008_v60 = vsel %vm2007_vm5, %v2814_v27, %v2004_v2  ;;  %v2071_v35 = vmul.f32 %v2818_v0, %v2070_v5 }
 0x818   : > { %v2079_v43 = vmul.f32 %v2008_v60, %v3739_v14  ;;  %2605 = vmatmul.msk.bf16.vlgmr.msra.gmra.mxu3 %vm981_vm2, %v2110_v47  ;;  %v2111_v23 = vpack.c.bf16 %v2106_v61, %v2105_v57  ;;  %v2068_v30 = vsel %vm2067_vm12, %v2816_v45, %v2064_v52  ;;  %p2843_p3 = pnand %p2842_p2, %p2838_p11 }
 0x819   : > { %v2072_v9 = vmul.f32 0.5, %v2071_v35  ;;  %v2085_v29 = vmul.f32 %v2068_v30, %v3755_v39 }
 0x81a   : > { %v2090_v10 = vmul.f32 %v3818_v36, %v2079_v43 }
 0x81b   : > { %v2073_v27 = vsub.f32 1.5, %v2072_v9  ;;  %v2096_v19 = vmul.f32 %v3818_v36, %v2085_v29 }
 0x81c   : > { %v2101_v17 = vadd.f32 %v2800_v51, %v2090_v10 }
 0x81d   : > { %v2074_v42 = vmul.f32 %v2818_v0, %v2073_v27  ;;  %v2107_v37 = vadd.f32 %v2800_v51, %v2096_v19 }
 0x81e   : > { %v2109_v14 = vpack.c.bf16 %v2102_v49, %v2101_v17 }
 0x81f   : > { %v2078_v8 = vsel %vm2077_vm11, %v2818_v0, %v2074_v42 }
 0x820   : > { %2604 = vmatmul.msk.bf16.vlgmr.msra.gmra.mxu0 %vm981_vm2, %v2109_v14  ;;  %v2086_v55 = vmul.f32 %v2078_v8, %v3758_v11  ;;  %v2647_v11 = vld [vmem:[%s4079_s21] sm:$0xff] }
 0x821   : > { %2214 = vmatpush.bf16.msra.mxu1 %v2647_v11  ;;  %2655 = vmatpush.bf16.msra.mxu2 %v2647_v11 }
 0x822   : > { %v2097_v62 = vmul.f32 %v3818_v36, %v2086_v55  ;;  %v2801_v36 = vld [vmem:[%s4080_s13] ss:$0 sm:$0xff] }
 0x824   : > { %v2108_v56 = vadd.f32 %v2800_v51, %v2097_v62 }
 0x826   : > { %v2112_v40 = vpack.c.bf16 %v2108_v56, %v2107_v37 }
 0x828   : > { %2606 = vmatmul.msk.bf16.gmra.mxu3 %vm981_vm2, %v2111_v23 }
 0x838   : > { %2607 = vmatmul.msk.bf16.gmra.mxu3 %vm981_vm2, %v2112_v40 }
 0x89b   : > { %v2151_v39 = vpop.f32.mrf.mxu3 }
 0x89c   : > { %v2152_v50 = vadd.f32 %v2801_v36, %v2151_v39 }
 0x89d   : > { %v2146_v38 = vpop.f32.mrf.mxu0 }
 0x89e   : > { %v2147_v63 = vadd.f32 %v2801_v36, %v2146_v38  ;;  %v2168_v46 = vmax.f32 %v2152_v50, 0.0 }
 0x8a0   : > { %v2166_v45 = vmax.f32 %v2147_v63, 0.0 }
 0x8a3   : > { %v2153_v44 = vpop.f32.mrf.mxu3 }
 0x8a4   : > { %v2154_v7 = vadd.f32 %v2801_v36, %v2153_v44 }
 0x8a5   : > { %v2148_v28 = vpop.f32.mrf.mxu0 }
 0x8a6   : > { %v2149_v51 = vadd.f32 %v2801_v36, %v2148_v28  ;;  %v2169_v5 = vmax.f32 %v2154_v7, 0.0 }
 0x8a8   : > { %v2167_v53 = vmax.f32 %v2149_v51, 0.0  ;;  %v2175_v60 = vpack.c.bf16 %v2169_v5, %v2168_v46 }
 0x8aa   : > { %v2174_v59 = vpack.c.bf16 %v2167_v53, %v2166_v45 }
 0x8ab   : > { %v2156_v0 = vpop.f32.mrf.mxu3 }
 0x8ac   : > { %2616 = vmatmul.msk.bf16.vlgmr.msra.gmra.mxu1 %vm2194_vm13, %v2174_v59  ;;  %v2157_v34 = vadd.f32 %v2801_v36, %v2156_v0 }
 0x8ae   : > { %v2170_v13 = vmax.f32 %v2157_v34, 0.0 }
 0x8b3   : > { %v2158_v2 = vpop.f32.mrf.mxu3 }
 0x8b4   : > { %v2159_v1 = vadd.f32 %v2801_v36, %v2158_v2 }
 0x8b6   : > { %v2171_v20 = vmax.f32 %v2159_v1, 0.0 }
 0x8b8   : > { %v2176_v47 = vpack.c.bf16 %v2171_v20, %v2170_v13 }
 0x8ba   : > { %2618 = vmatmul.msk.bf16.vlgmr.msra.gmra.mxu2 %vm2194_vm13, %v2176_v47 }
 0x8bb   : > { %v2161_v43 = vpop.f32.mrf.mxu3 }
 0x8bc   : > { %2617 = vmatmul.msk.bf16.gmra.mxu1 %vm2194_vm13, %v2175_v60  ;;  %v2162_v24 = vadd.f32 %v2801_v36, %v2161_v43 }
 0x8be   : > { %v2172_v10 = vmax.f32 %v2162_v24, 0.0 }
 0x8c3   : > { %v2163_v35 = vpop.f32.mrf.mxu3 }
 0x8c4   : > { %v2164_v21 = vadd.f32 %v2801_v36, %v2163_v35 }
 0x8c6   : > { %v2173_v3 = vmax.f32 %v2164_v21, 0.0 }
 0x8c8   : > { %v2177_v18 = vpack.c.bf16 %v2173_v3, %v2172_v10 }
 0x8ca   : > { %2619 = vmatmul.msk.bf16.gmra.mxu2 %vm2194_vm13, %v2177_v18 }
 0x8cb   : > { %2846 = shalt.err (!%p2843_p3)
}
 0x8cc   : > { %2656 = dma.vmem_to_hbm [thread:$0]  (%p3155_p7), %s2282_s28, 128, %s2284_s29, %s2265_s3  }
 0x8cd   : > { %s4084_s4 = sld [smem:[#allocation42_spill]]  ;;  %s2649_s7 = sshll.u32 (%p3176_p13), %s2913_s0, 4 }
 0x8ce   : > { %s2292_s2 = sadd.s32 (%p3176_p13), %s2917_s10, %s2649_s7  ;;  %s4086_s1 = sld [smem:[#allocation44_spill]] (%p3176_p13) }
 0x8cf   : > { %s2625_s8 = sshll.u32 (%p3176_p13), %s2292_s2, 3 }
 0x8d3   : > { %v2802_v17 = vld [vmem:[%s4084_s4] ss:$0 sm:$0xff] }
 0x8d4   : > { %s2294_s3 = scalar_lea.vmem (%p3176_p13), %s4086_s1, %s2625_s8 }
 0x929   : > { %v2216_v49 = vpop.f32.mrf.mxu1 }
 0x92a   : > { %v2236_v41 = vadd.f32 %v2216_v49, %v3505_v48 }
 0x92c   : > { %v2248_v9 = vadd.f32 %v2802_v17, %v2236_v41 }
 0x92e   : > { %2256 = vst.msk [vmem:[%s3219_s6] sm:$0xff] %vm981_vm2, %v2248_v9 }
 0x931   : > { %v2218_v14 = vpop.f32.mrf.mxu1 }
 0x932   : > { %v2237_v25 = vadd.f32 %v2218_v14, %v3493_v58 }
 0x934   : > { %v2249_v16 = vadd.f32 %v2802_v17, %v2237_v25 }
 0x936   : > { %2257 = vst.msk [vmem:[%s3219_s6 + $0x8] sm:$0xff] %vm981_vm2, %v2249_v16 }
 0x939   : > { %v2221_v6 = vpop.f32.mrf.mxu1 }
 0x93a   : > { %v2238_v27 = vadd.f32 %v2221_v6, %v3519_v12 }
 0x93c   : > { %v2250_v22 = vadd.f32 %v2802_v17, %v2238_v27 }
 0x93d   : > { %v2226_v48 = vpop.f32.mrf.mxu2 }
 0x93e   : > { %2258 = vst.msk [vmem:[%s3219_s6 + $0x10] sm:$0xff] %vm981_vm2, %v2250_v22  ;;  %v2240_v54 = vadd.f32 %v2226_v48, %v3525_v15 }
 0x940   : > { %v2252_v42 = vadd.f32 %v2802_v17, %v2240_v54 }
 0x941   : > { %v2223_v61 = vpop.f32.mrf.mxu1 }
 0x942   : > { %v2239_v57 = vadd.f32 %v2223_v61, %v3501_v4  ;;  %2260 = vst.msk [vmem:[%s3219_s6 + $0x20] sm:$0xff] %vm981_vm2, %v2252_v42 }
 0x944   : > { %v2251_v58 = vadd.f32 %v2802_v17, %v2239_v57 }
 0x945   : > { %v2228_v52 = vpop.f32.mrf.mxu2 }
 0x946   : > { %2259 = vst.msk [vmem:[%s3219_s6 + $0x18] sm:$0xff] %vm981_vm2, %v2251_v58  ;;  %v2241_v12 = vadd.f32 %v2228_v52, %v3531_v26  ;;  %v2337_v26 = vld [vmem:[%s3219_s6] sm:$0xff] (%p3176_p13) }
 0x947   : > { %2338 = vst [vmem:[%s2294_s3] sm:$0xff] (%p3176_p13), %v2337_v26 }
 0x948   : > { %v2253_v23 = vadd.f32 %v2802_v17, %v2241_v12 }
 0x949   : > { %v2345_v19 = vld [vmem:[%s3219_s6 + $0x20] sm:$0xff] (%p3176_p13) }
 0x94a   : > { %2261 = vst.msk [vmem:[%s3219_s6 + $0x28] sm:$0xff] %vm981_vm2, %v2253_v23 }
 0x94b   : > { %2346 = vst [vmem:[%s2294_s3 + $0x40] sm:$0xff] (%p3176_p13), %v2345_v19 }
 0x94d   : > { %v2231_v8 = vpop.f32.mrf.mxu2  ;;  %v2343_v62 = vld [vmem:[%s3219_s6 + $0x18] sm:$0xff] (%p3176_p13) }
 0x94e   : > { %v2242_v30 = vadd.f32 %v2231_v8, %v3543_v33  ;;  %v2339_v33 = vld [vmem:[%s3219_s6 + $0x8] sm:$0xff] (%p3176_p13)  ;;  %2344 = vst [vmem:[%s2294_s3 + $0x30] sm:$0xff] (%p3176_p13), %v2343_v62 }
 0x94f   : > { %2340 = vst [vmem:[%s2294_s3 + $0x10] sm:$0xff] (%p3176_p13), %v2339_v33 }
 0x950   : > { %v2254_v15 = vadd.f32 %v2802_v17, %v2242_v30 }
 0x951   : > { %v2347_v56 = vld [vmem:[%s3219_s6 + $0x28] sm:$0xff] (%p3176_p13) }
 0x952   : > { %2262 = vst.msk [vmem:[%s3219_s6 + $0x30] sm:$0xff] %vm981_vm2, %v2254_v15 }
 0x953   : > { %2348 = vst [vmem:[%s2294_s3 + $0x50] sm:$0xff] (%p3176_p13), %v2347_v56 }
 0x955   : > { %v2233_v55 = vpop.f32.mrf.mxu2 }
 0x956   : > { %v2243_v4 = vadd.f32 %v2233_v55, %v3573_v32  ;;  %2289 = sbr.rel (!%p3176_p13) target bundleno = 2403 (0x963), region = 178  ;;  %v2341_v32 = vld [vmem:[%s3219_s6 + $0x10] sm:$0xff] (%p3176_p13) }
 0x957   : > { %2342 = vst [vmem:[%s2294_s3 + $0x20] sm:$0xff] (%p3176_p13), %v2341_v32 }
 0x958   : > { %v2255_v29 = vadd.f32 %v2802_v17, %v2243_v4 }
 0x959   : > { %v2349_v37 = vld [vmem:[%s3219_s6 + $0x30] sm:$0xff] (%p3176_p13) }
 0x95a   : > { %2263 = vst.msk [vmem:[%s3219_s6 + $0x38] sm:$0xff] %vm981_vm2, %v2255_v29 }
 0x95b   : > { %2350 = vst [vmem:[%s2294_s3 + $0x60] sm:$0xff] %v2349_v37 }
 0x961   : > { %v2351_v40 = vld [vmem:[%s3219_s6 + $0x38] sm:$0xff] }
 0x962   : > { %2352 = vst [vmem:[%s2294_s3 + $0x70] sm:$0xff] %v2351_v40 }
 0x963 PF: > { %s4087_s0 = sld [smem:[#allocation17_spill]] }
 0x964   : > { %s4088_s10 = sld [smem:[#allocation12_spill]] }
 0x969   : > { %p2662_p7 = scmp.ge.s32.totalorder %s4087_s0, 2 }
 0x96a   : > { %s2364_s25 = sand.u32 1, %s4088_s10  }
 0x96b   : > { %p2659_p13 = pnand %p2662_p7, %p3163_p12  ;;  %s2365_s13 = scalar_lea.sflag [#allocation9], %s2364_s25 }
 0x96d   : > { %p2660_p4 = pneg %p2659_p13 }
 0x96f   : > { %2888 = dma.done.wait (%p2660_p4), %s2365_s13, 128  }
 0x970   : > { %2890 = vsyncadd (%p2660_p4), %s2365_s13, 4294967168  ;;  %s42_s13 = sadd.s32 1, %s4087_s0   ;;  %s4090_s6 = sld [smem:[#allocation13_spill]] }
 0x971   : > { %p39_p5 = scmp.ge.s32.totalorder %s42_s13, 6   ;;  %s4091_s9 = sld [smem:[#allocation22_spill]] }
 0x972   : > { %s4092_s5 = sld [smem:[#allocation14_spill]]  ;;  %s4098_s8 = smov %s2897_s30 }
 0x973   : > { %s4093_s28 = sld [smem:[#allocation23_spill]]  ;;  %41 = sbr.rel (!%p39_p5) target bundleno = 28 (0x1c), region = 269 }
 0x974   : > { %s4094_s0 = sld [smem:[#allocation15_spill]] }
 0x975   : > { %s4095_s10 = sld [smem:[#allocation16_spill]] }
 0x976   : > { %s4096_s29 = sld [smem:[#allocation18_spill]]  ;;  %s4099_s30 = smov %s4090_s6 }
 0x977   : > { %s4097_s1 = sld [smem:[#allocation19_spill]] }
 0x978   :  { %2378 = vsyncpa [#allocation9], 1 }
 0x979   :  { %2380 = vsyncpa [#allocation9 + $0x1], 1 }

</bundles_post_ra>
